<compile_context>
chip_gen: v6e
topology: v6e:2x2x1
jax: 0.10.0
libtpu: 0.0.40
codegen_flags: <defaults>
</compile_context>

<pallas_src>
import functools
import math

import jax
import jax.numpy as jnp
from jax.experimental import pallas as pl
from jax.experimental.pallas import tpu as pltpu


EPS = 1e-5
_VMEM_LIMIT = 48 * 1024 * 1024   # explicit scoped-VMEM cap (fits v7x's 64 MiB)


def _round_up(n, m):
    return ((n + m - 1) // m) * m


# ---------------------------------------------------------------------------
# Kernel 1: per-column sum / sum-of-squares (train-mode BatchNorm statistics)
# ---------------------------------------------------------------------------
def _stats_kernel(x_ref, out_ref, *, rows_valid, block_rows):
    i = pl.program_id(0)

    @pl.when(i == 0)
    def _init():
        out_ref[...] = jnp.zeros_like(out_ref)

    x = x_ref[...].astype(jnp.float32)
    row = jax.lax.broadcasted_iota(jnp.int32, x.shape, 0) + i * block_rows
    xm = jnp.where(row < rows_valid, x, 0.0)      # ignore batch-padding rows
    s = jnp.sum(xm, axis=0, keepdims=True)        # one-pass: sum
    sq = jnp.sum(xm * xm, axis=0, keepdims=True)  #           sum of squares
    out_ref[...] += jnp.concatenate([s, sq], axis=0)


def _column_stats(xp, rows_valid, block_rows):
    """Biased batch mean/variance of the first `rows_valid` rows of xp."""
    Bp, Cp = xp.shape
    nb = Bp // block_rows
    sums = pl.pallas_call(
        functools.partial(_stats_kernel, rows_valid=rows_valid,
                          block_rows=block_rows),
        out_shape=jax.ShapeDtypeStruct((2, Cp), jnp.float32),
        grid=(nb,),
        in_specs=[pl.BlockSpec((block_rows, Cp), lambda i: (i, 0))],
        out_specs=pl.BlockSpec((2, Cp), lambda i: (0, 0)),   # resident accumulator
        compiler_params=pltpu.CompilerParams(
            dimension_semantics=("arbitrary",),
            vmem_limit_bytes=_VMEM_LIMIT),
    )(xp)
    inv_n = 1.0 / float(rows_valid)
    mean = sums[0:1] * inv_n
    var = jnp.maximum(sums[1:2] * inv_n - mean * mean, 0.0)
    return mean, var


def _bn_fold(mean, var, gamma, beta):
    """Fold train-mode BN into a per-column affine: y = x * scale + shift."""
    scale = gamma * jax.lax.rsqrt(var + EPS)
    shift = beta - mean * scale
    return scale, shift


# ---------------------------------------------------------------------------
# Kernel 2: Resblock (BN folded) + SELayer + residual
# ---------------------------------------------------------------------------
def _resblock_kernel(x_ref, scale_ref, shift_ref,
                     w1_ref, b1_ref, w2_ref, b2_ref,
                     wse1_ref, bse1_ref, wse2_ref, bse2_ref,
                     o_ref, *, compute_dtype):
    cd = compute_dtype

    def mm(a, w_ref, b_ref):   # bf16 operands, f32 MXU accumulation
        return jnp.dot(a.astype(cd), w_ref[...].astype(cd),
                       preferred_element_type=jnp.float32) + b_ref[...]

    x = x_ref[...].astype(jnp.float32)
    xn = x * scale_ref[...] + shift_ref[...]           # folded train-mode BN1
    h = jnp.maximum(mm(xn, w1_ref, b1_ref), 0.0)       # hidden1 + relu
    h2 = mm(h, w2_ref, b2_ref)                         # hidden2
    s = jnp.maximum(mm(h2, wse1_ref, bse1_ref), 0.0)   # SE fc1 + relu
    s = jax.nn.sigmoid(mm(s, wse2_ref, bse2_ref))      # SE fc2 + sigmoid
    o_ref[...] = (h2 * s + x).astype(o_ref.dtype)      # SE scale + residual


# ---------------------------------------------------------------------------
# Kernel 3: MlpBlock (BN folded) + shortcut
# ---------------------------------------------------------------------------
def _mlp_kernel(x_ref, scale_ref, shift_ref,
                wd1_ref, bd1_ref, wd2_ref, bd2_ref,
                o_ref, *, compute_dtype, approx_gelu):
    cd = compute_dtype

    def mm(a, w_ref, b_ref):
        return jnp.dot(a.astype(cd), w_ref[...].astype(cd),
                       preferred_element_type=jnp.float32) + b_ref[...]

    x = x_ref[...].astype(jnp.float32)
    xn = x * scale_ref[...] + shift_ref[...]           # folded train-mode BN2
    m = mm(xn, wd1_ref, bd1_ref)
    if approx_gelu:
        m = jax.nn.gelu(m, approximate=True)           # tanh GELU (EUP relief)
    else:
        # exact GELU (nn.GELU default): 0.5*x*(1+erf(x/sqrt(2)))
        m = 0.5 * m * (1.0 + jax.lax.erf(m * (1.0 / math.sqrt(2.0))))
    m = mm(m, wd2_ref, bd2_ref)
    o_ref[...] = (m + x).astype(o_ref.dtype)           # + shortcut


# ---------------------------------------------------------------------------
# Wrapper
# ---------------------------------------------------------------------------
def _pad2(a, rows, cols):
    return jnp.pad(a, ((0, rows - a.shape[0]), (0, cols - a.shape[1])))


@functools.partial(jax.jit,
                   static_argnames=("block_rows", "approx_gelu", "compute_dtype"))
def res_attention(x, params, *, block_rows=256, approx_gelu=False,
                  compute_dtype=jnp.bfloat16):
    B, C = x.shape
    Cr = params["wse1"].shape[1]

    Cp = _round_up(C, 128)           # lane-dense feature dim
    C2p = 2 * Cp                     # lane-dense hidden dim
    Crp = _round_up(Cr, 128)         # lane-dense SE bottleneck
    bB = min(block_rows, _round_up(max(B, 128), 8))    # row tile, >= 128 rows
    Bp = _round_up(B, bB)
    nb = Bp // bB

    xp = _pad2(x.astype(jnp.float32), Bp, Cp)

    # Zero-padded parameters (padded columns have gamma=beta=0 => stay zero).
    w1 = _pad2(params["w1"], Cp, C2p);     b1 = _pad2(params["b1"], 1, C2p)
    w2 = _pad2(params["w2"], C2p, Cp);     b2 = _pad2(params["b2"], 1, Cp)
    wse1 = _pad2(params["wse1"], Cp, Crp); bse1 = _pad2(params["bse1"], 1, Crp)
    wse2 = _pad2(params["wse2"], Crp, Cp); bse2 = _pad2(params["bse2"], 1, Cp)
    wd1 = _pad2(params["wd1"], Cp, C2p);   bd1 = _pad2(params["bd1"], 1, C2p)
    wd2 = _pad2(params["wd2"], C2p, Cp);   bd2 = _pad2(params["bd2"], 1, Cp)
    g1 = _pad2(params["bn1_g"], 1, Cp);    be1 = _pad2(params["bn1_b"], 1, Cp)
    g2 = _pad2(params["bn2_g"], 1, Cp);    be2 = _pad2(params["bn2_b"], 1, Cp)

    row_spec = pl.BlockSpec((bB, Cp), lambda i: (i, 0))

    def full(shape):
        # Constant block index across the grid => DMA'd once, VMEM-resident.
        return pl.BlockSpec(shape, lambda i: (0, 0))

    cparams = pltpu.CompilerParams(
        dimension_semantics=("parallel",),   # shard batch tiles across v7x TCs
        vmem_limit_bytes=_VMEM_LIMIT)

    # ---- Resblock: BN1 stats pre-pass, then fused tiled compute -------------
    mean1, var1 = _column_stats(xp, B, bB)
    scale1, shift1 = _bn_fold(mean1, var1, g1, be1)

    res_out = pl.pallas_call(
        functools.partial(_resblock_kernel, compute_dtype=compute_dtype),
        out_shape=jax.ShapeDtypeStruct((Bp, Cp), jnp.float32),
        grid=(nb,),
        in_specs=[
            row_spec,                # x (tiled over batch)
            full((1, Cp)),           # scale1
            full((1, Cp)),           # shift1
            full((Cp, C2p)),         # w1
            full((1, C2p)),          # b1
            full((C2p, Cp)),         # w2
            full((1, Cp)),           # b2
            full((Cp, Crp)),         # wse1
            full((1, Crp)),          # bse1
            full((Crp, Cp)),         # wse2
            full((1, Cp)),           # bse2
        ],
        out_specs=row_spec,
        compiler_params=cparams,
    )(xp, scale1, shift1, w1, b1, w2, b2, wse1, bse1, wse2, bse2)

    # ---- MlpBlock: BN2 stats pre-pass on Resblock output, then fused MLP ----
    mean2, var2 = _column_stats(res_out, B, bB)
    scale2, shift2 = _bn_fold(mean2, var2, g2, be2)

    out_p = pl.pallas_call(
        functools.partial(_mlp_kernel, compute_dtype=compute_dtype,
                          approx_gelu=approx_gelu),
        out_shape=jax.ShapeDtypeStruct((Bp, Cp), jnp.float32),
        grid=(nb,),
        in_specs=[
            row_spec,                # res_out (tiled over batch)
            full((1, Cp)),           # scale2
            full((1, Cp)),           # shift2
            full((Cp, C2p)),         # wd1
            full((1, C2p)),          # bd1
            full((C2p, Cp)),         # wd2
            full((1, Cp)),           # bd2
        ],
        out_specs=row_spec,
        compiler_params=cparams,
    )(res_out, scale2, shift2, wd1, bd1, wd2, bd2)

    return out_p[:B, :C].astype(x.dtype)


# ---------------------------------------------------------------------------
# Parameter init + pure-JAX reference (mirrors the kernel numerics)
# ---------------------------------------------------------------------------
def init_params(key, C, reduction=16, weight_dtype=jnp.bfloat16):
    """Synthetic parameters; shapes follow the torch module. Weights in bf16."""
    C2 = 2 * C
    Cr = max(C // reduction, 1)
    ks = jax.random.split(key, 6)

    def lin(k, fan_in, fan_out):
        bound = 1.0 / math.sqrt(fan_in)
        kw, kb = jax.random.split(k)
        w = jax.random.uniform(kw, (fan_in, fan_out), jnp.float32, -bound, bound)
        b = jax.random.uniform(kb, (1, fan_out), jnp.float32, -bound, bound)
        return w.astype(weight_dtype), b

    w1, b1 = lin(ks[0], C, C2)        # Resblock.hidden1
    w2, b2 = lin(ks[1], C2, C)        # Resblock.hidden2
    wse1, bse1 = lin(ks[2], C, Cr)    # SELayer.fc[0]
    wse2, bse2 = lin(ks[3], Cr, C)    # SELayer.fc[2]
    wd1, bd1 = lin(ks[4], C, C2)      # MlpBlock.dense_1
    wd2, bd2 = lin(ks[5], C2, C)      # MlpBlock.dense_2

    return dict(
        bn1_g=jnp.ones((1, C), jnp.float32), bn1_b=jnp.zeros((1, C), jnp.float32),
        w1=w1, b1=b1, w2=w2, b2=b2,
        wse1=wse1, bse1=bse1, wse2=wse2, bse2=bse2,
        bn2_g=jnp.ones((1, C), jnp.float32), bn2_b=jnp.zeros((1, C), jnp.float32),
        wd1=wd1, bd1=bd1, wd2=wd2, bd2=bd2,
    )


def _reference(x, p, *, compute_dtype=jnp.bfloat16, approx_gelu=False):
    """Pure-JAX forward pass with the same numerics as the Pallas kernels."""
    cd = compute_dtype

    def bn(v, g, b):
        n = v.shape[0]
        s = jnp.sum(v, axis=0, keepdims=True)
        sq = jnp.sum(v * v, axis=0, keepdims=True)
        mean = s / n
        var = jnp.maximum(sq / n - mean * mean, 0.0)
        scale = g * jax.lax.rsqrt(var + EPS)
        shift = b - mean * scale
        return v * scale + shift

    def mm(a, w, b):
        return jnp.dot(a.astype(cd), w.astype(cd),
                       preferred_element_type=jnp.float32) + b

    residual = x
    xn = bn(x, p["bn1_g"], p["bn1_b"])
    h = jnp.maximum(mm(xn, p["w1"], p["b1"]), 0.0)
    h2 = mm(h, p["w2"], p["b2"])
    s = jnp.maximum(mm(h2, p["wse1"], p["bse1"]), 0.0)
    s = jax.nn.sigmoid(mm(s, p["wse2"], p["bse2"]))
    y = h2 * s + residual

    shortcut = y
    yn = bn(y, p["bn2_g"], p["bn2_b"])
    m = mm(yn, p["wd1"], p["bd1"])
    if approx_gelu:
        m = jax.nn.gelu(m, approximate=True)
    else:
        m = 0.5 * m * (1.0 + jax.lax.erf(m * (1.0 / math.sqrt(2.0))))
    m = mm(m, p["wd2"], p["bd2"])
    return m + shortcut


if __name__ == "__main__":
    # Small config (exercises B/C padding) and a lane/tile-aligned config
    # (exercises a multi-tile parallel batch grid).
    for (B, C) in [(8, 64), (512, 128)]:
        key = jax.random.PRNGKey(0)
        kx, kp = jax.random.split(key)
        x = jax.random.normal(kx, (B, C), jnp.float32)
        params = init_params(kp, C)

        out = jax.block_until_ready(res_attention(x, params))
        ref = _reference(x, params)

        assert out.shape == (B, C)
        assert jnp.allclose(out, ref, atol=2e-2, rtol=2e-2), (
            f"mismatch for B={B}, C={C}: "
            f"max abs err {float(jnp.max(jnp.abs(out - ref)))}")
    print("KERNEL_OK")
</pallas_src>

<mosaic_0001>
module attributes {stable_mosaic.version = 11 : i64} {
  func.func @_stats_kernel(%arg0: i32, %arg1: memref<128x128xf32, #tpu.memory_space<vmem>>, %arg2: memref<2x128xf32, #tpu.memory_space<vmem>>) attributes {dimension_semantics = [#tpu.dimension_semantics<arbitrary>], iteration_bounds = array<i64: 1>, scalar_prefetch = 0 : i64, scratch_operands = 0 : i64, tpu.core_type = #tpu.core_type<tc>, window_params = [{transform_indices = @transform_0, window_bounds = array<i64: 128, 128>}, {pipeline_mode = #tpu.pipeline_mode<synchronous>, transform_indices = @transform_1, window_bounds = array<i64: 2, 128>}]} {
    %c0_i32 = arith.constant 0 : i32
    %0 = arith.cmpi eq, %arg0, %c0_i32 : i32
    %1 = arith.extui %0 : i1 to i32
    %c0_i32_0 = arith.constant 0 : i32
    %2 = arith.cmpi ne, %1, %c0_i32_0 : i32
    scf.if %2 {
      %cst_8 = arith.constant 0.000000e+00 : f32
      %21 = vector.broadcast %cst_8 : f32 to vector<2x128xf32>
      %c0_9 = arith.constant 0 : index
      %c0_10 = arith.constant 0 : index
      %22 = vector.load %arg2[%c0_9, %c0_10] : memref<2x128xf32, #tpu.memory_space<vmem>>, vector<2x128xf32>
      tpu.vector_store %arg2[%c0_9, %c0_10], %21 {strides = array<i32>} : memref<2x128xf32, #tpu.memory_space<vmem>>, vector<2x128xf32>,
    } else {
    }
    %c0 = arith.constant 0 : index
    %c0_1 = arith.constant 0 : index
    %3 = vector.load %arg1[%c0, %c0_1] : memref<128x128xf32, #tpu.memory_space<vmem>>, vector<128x128xf32>
    %4 = tpu.iota {dimensions = array<i32: 0>} : vector<128x128xi32>
    %c128_i32 = arith.constant 128 : i32
    %5 = arith.muli %arg0, %c128_i32 : i32
    %6 = vector.broadcast %5 : i32 to vector<128x128xi32>
    %7 = arith.addi %4, %6 : vector<128x128xi32>
    %c8_i32 = arith.constant 8 : i32
    %8 = vector.broadcast %c8_i32 : i32 to vector<128x128xi32>
    %9 = arith.cmpi slt, %7, %8 : vector<128x128xi32>
    %cst = arith.constant 0.000000e+00 : f32
    %10 = vector.broadcast %cst : f32 to vector<128x128xf32>
    %11 = arith.select %9, %3, %10 : vector<128x128xi1>, vector<128x128xf32>
    %cst_2 = arith.constant dense<0.000000e+00> : vector<128xf32>
    %12 = vector.multi_reduction <add>, %11, %cst_2 [0] : vector<128x128xf32> to vector<128xf32>
    %13 = vector.shape_cast %12 : vector<128xf32> to vector<1x128xf32>
    %14 = arith.mulf %11, %11 : vector<128x128xf32>
    %cst_3 = arith.constant dense<0.000000e+00> : vector<128xf32>
    %15 = vector.multi_reduction <add>, %14, %cst_3 [0] : vector<128x128xf32> to vector<128xf32>
    %16 = vector.shape_cast %15 : vector<128xf32> to vector<1x128xf32>
    %c0_4 = arith.constant 0 : index
    %c0_5 = arith.constant 0 : index
    %17 = vector.load %arg2[%c0_4, %c0_5] : memref<2x128xf32, #tpu.memory_space<vmem>>, vector<2x128xf32>
    %18 = tpu.concatenate %13, %16 in 0 : vector<1x128xf32>, vector<1x128xf32> -> vector<2x128xf32>
    %19 = arith.addf %17, %18 : vector<2x128xf32>
    %c0_6 = arith.constant 0 : index
    %c0_7 = arith.constant 0 : index
    %20 = vector.load %arg2[%c0_6, %c0_7] : memref<2x128xf32, #tpu.memory_space<vmem>>, vector<2x128xf32>
    tpu.vector_store %arg2[%c0_6, %c0_7], %19 {strides = array<i32>} : memref<2x128xf32, #tpu.memory_space<vmem>>, vector<2x128xf32>,
    return
  }
  func.func @transform_0(%arg0: i32) -> (i32, i32) {
    %c0_i32 = arith.constant 0 : i32
    %c0_i32_0 = arith.constant 0 : i32
    return %arg0, %c0_i32 : i32, i32
  }
  func.func @transform_1(%arg0: i32) -> (i32, i32) {
    %c0_i32 = arith.constant 0 : i32
    %c0_i32_0 = arith.constant 0 : i32
    %c0_i32_1 = arith.constant 0 : i32
    return %c0_i32, %c0_i32_0 : i32, i32
  }
}

module attributes {stable_mosaic.version = 11 : i64} {
  func.func @_resblock_kernel(%arg0: i32, %arg1: memref<128x128xf32, #tpu.memory_space<vmem>>, %arg2: memref<1x128xf32, #tpu.memory_space<vmem>>, %arg3: memref<1x128xf32, #tpu.memory_space<vmem>>, %arg4: memref<128x256xbf16, #tpu.memory_space<vmem>>, %arg5: memref<1x256xf32, #tpu.memory_space<vmem>>, %arg6: memref<256x128xbf16, #tpu.memory_space<vmem>>, %arg7: memref<1x128xf32, #tpu.memory_space<vmem>>, %arg8: memref<128x128xbf16, #tpu.memory_space<vmem>>, %arg9: memref<1x128xf32, #tpu.memory_space<vmem>>, %arg10: memref<128x128xbf16, #tpu.memory_space<vmem>>, %arg11: memref<1x128xf32, #tpu.memory_space<vmem>>, %arg12: memref<128x128xf32, #tpu.memory_space<vmem>>) attributes {dimension_semantics = [#tpu.dimension_semantics<parallel>], iteration_bounds = array<i64: 1>, scalar_prefetch = 0 : i64, scratch_operands = 0 : i64, tpu.core_type = #tpu.core_type<tc>, window_params = [{transform_indices = @transform_0, window_bounds = array<i64: 128, 128>}, {pipeline_mode = #tpu.pipeline_mode<synchronous>, transform_indices = @transform_1, window_bounds = array<i64: 1, 128>}, {pipeline_mode = #tpu.pipeline_mode<synchronous>, transform_indices = @transform_2, window_bounds = array<i64: 1, 128>}, {pipeline_mode = #tpu.pipeline_mode<synchronous>, transform_indices = @transform_3, window_bounds = array<i64: 128, 256>}, {pipeline_mode = #tpu.pipeline_mode<synchronous>, transform_indices = @transform_4, window_bounds = array<i64: 1, 256>}, {pipeline_mode = #tpu.pipeline_mode<synchronous>, transform_indices = @transform_5, window_bounds = array<i64: 256, 128>}, {pipeline_mode = #tpu.pipeline_mode<synchronous>, transform_indices = @transform_6, window_bounds = array<i64: 1, 128>}, {pipeline_mode = #tpu.pipeline_mode<synchronous>, transform_indices = @transform_7, window_bounds = array<i64: 128, 128>}, {pipeline_mode = #tpu.pipeline_mode<synchronous>, transform_indices = @transform_8, window_bounds = array<i64: 1, 128>}, {pipeline_mode = #tpu.pipeline_mode<synchronous>, transform_indices = @transform_9, window_bounds = array<i64: 128, 128>}, {pipeline_mode = #tpu.pipeline_mode<synchronous>, transform_indices = @transform_10, window_bounds = array<i64: 1, 128>}, {transform_indices = @transform_11, window_bounds = array<i64: 128, 128>}]} {
    %c0 = arith.constant 0 : index
    %c0_0 = arith.constant 0 : index
    %0 = vector.load %arg1[%c0, %c0_0] : memref<128x128xf32, #tpu.memory_space<vmem>>, vector<128x128xf32>
    %c0_1 = arith.constant 0 : index
    %c0_2 = arith.constant 0 : index
    %1 = vector.load %arg2[%c0_1, %c0_2] : memref<1x128xf32, #tpu.memory_space<vmem>>, vector<1x128xf32>
    %2 = vector.broadcast %1 : vector<1x128xf32> to vector<128x128xf32>
    %3 = arith.mulf %0, %2 : vector<128x128xf32>
    %c0_3 = arith.constant 0 : index
    %c0_4 = arith.constant 0 : index
    %4 = vector.load %arg3[%c0_3, %c0_4] : memref<1x128xf32, #tpu.memory_space<vmem>>, vector<1x128xf32>
    %5 = vector.broadcast %4 : vector<1x128xf32> to vector<128x128xf32>
    %6 = arith.addf %3, %5 : vector<128x128xf32>
    %7 = arith.truncf %6 : vector<128x128xf32> to vector<128x128xbf16>
    %c0_5 = arith.constant 0 : index
    %c0_6 = arith.constant 0 : index
    %8 = vector.load %arg4[%c0_5, %c0_6] : memref<128x256xbf16, #tpu.memory_space<vmem>>, vector<128x256xbf16>
    %cst = arith.constant dense<0.000000e+00> : vector<128x256xf32>
    %9 = tpu.matmul %7, %8, %cst {dimension_numbers = #tpu.dot_dimension_numbers<[1], [0], [0], [1], [0, 0, 1, 1], [], []>} : vector<128x128xbf16>, vector<128x256xbf16>, vector<128x256xf32> -> vector<128x256xf32>
    %c0_7 = arith.constant 0 : index
    %c0_8 = arith.constant 0 : index
    %10 = vector.load %arg5[%c0_7, %c0_8] : memref<1x256xf32, #tpu.memory_space<vmem>>, vector<1x256xf32>
    %11 = vector.broadcast %10 : vector<1x256xf32> to vector<128x256xf32>
    %12 = arith.addf %9, %11 : vector<128x256xf32>
    %cst_9 = arith.constant 0.000000e+00 : f32
    %13 = vector.broadcast %cst_9 : f32 to vector<128x256xf32>
    %14 = arith.maximumf %12, %13 : vector<128x256xf32>
    %15 = arith.truncf %14 : vector<128x256xf32> to vector<128x256xbf16>
    %c0_10 = arith.constant 0 : index
    %c0_11 = arith.constant 0 : index
    %16 = vector.load %arg6[%c0_10, %c0_11] : memref<256x128xbf16, #tpu.memory_space<vmem>>, vector<256x128xbf16>
    %cst_12 = arith.constant dense<0.000000e+00> : vector<128x128xf32>
    %17 = tpu.matmul %15, %16, %cst_12 {dimension_numbers = #tpu.dot_dimension_numbers<[1], [0], [0], [1], [0, 0, 1, 1], [], []>} : vector<128x256xbf16>, vector<256x128xbf16>, vector<128x128xf32> -> vector<128x128xf32>
    %c0_13 = arith.constant 0 : index
    %c0_14 = arith.constant 0 : index
    %18 = vector.load %arg7[%c0_13, %c0_14] : memref<1x128xf32, #tpu.memory_space<vmem>>, vector<1x128xf32>
    %19 = vector.broadcast %18 : vector<1x128xf32> to vector<128x128xf32>
    %20 = arith.addf %17, %19 : vector<128x128xf32>
    %21 = arith.truncf %20 : vector<128x128xf32> to vector<128x128xbf16>
    %c0_15 = arith.constant 0 : index
    %c0_16 = arith.constant 0 : index
    %22 = vector.load %arg8[%c0_15, %c0_16] : memref<128x128xbf16, #tpu.memory_space<vmem>>, vector<128x128xbf16>
    %cst_17 = arith.constant dense<0.000000e+00> : vector<128x128xf32>
    %23 = tpu.matmul %21, %22, %cst_17 {dimension_numbers = #tpu.dot_dimension_numbers<[1], [0], [0], [1], [0, 0, 1, 1], [], []>} : vector<128x128xbf16>, vector<128x128xbf16>, vector<128x128xf32> -> vector<128x128xf32>
    %c0_18 = arith.constant 0 : index
    %c0_19 = arith.constant 0 : index
    %24 = vector.load %arg9[%c0_18, %c0_19] : memref<1x128xf32, #tpu.memory_space<vmem>>, vector<1x128xf32>
    %25 = vector.broadcast %24 : vector<1x128xf32> to vector<128x128xf32>
    %26 = arith.addf %23, %25 : vector<128x128xf32>
    %cst_20 = arith.constant 0.000000e+00 : f32
    %27 = vector.broadcast %cst_20 : f32 to vector<128x128xf32>
    %28 = arith.maximumf %26, %27 : vector<128x128xf32>
    %29 = arith.truncf %28 : vector<128x128xf32> to vector<128x128xbf16>
    %c0_21 = arith.constant 0 : index
    %c0_22 = arith.constant 0 : index
    %30 = vector.load %arg10[%c0_21, %c0_22] : memref<128x128xbf16, #tpu.memory_space<vmem>>, vector<128x128xbf16>
    %cst_23 = arith.constant dense<0.000000e+00> : vector<128x128xf32>
    %31 = tpu.matmul %29, %30, %cst_23 {dimension_numbers = #tpu.dot_dimension_numbers<[1], [0], [0], [1], [0, 0, 1, 1], [], []>} : vector<128x128xbf16>, vector<128x128xbf16>, vector<128x128xf32> -> vector<128x128xf32>
    %c0_24 = arith.constant 0 : index
    %c0_25 = arith.constant 0 : index
    %32 = vector.load %arg11[%c0_24, %c0_25] : memref<1x128xf32, #tpu.memory_space<vmem>>, vector<1x128xf32>
    %33 = vector.broadcast %32 : vector<1x128xf32> to vector<128x128xf32>
    %34 = arith.addf %31, %33 : vector<128x128xf32>
    %35 = arith.negf %34 : vector<128x128xf32>
    %36 = math.exp %35 : vector<128x128xf32>
    %cst_26 = arith.constant 1.000000e+00 : f32
    %37 = vector.broadcast %cst_26 : f32 to vector<128x128xf32>
    %38 = arith.addf %37, %36 : vector<128x128xf32>
    %39 = arith.divf %37, %38 : vector<128x128xf32>
    %40 = arith.mulf %20, %39 : vector<128x128xf32>
    %41 = arith.addf %40, %0 : vector<128x128xf32>
    %c0_27 = arith.constant 0 : index
    %c0_28 = arith.constant 0 : index
    %42 = vector.load %arg12[%c0_27, %c0_28] : memref<128x128xf32, #tpu.memory_space<vmem>>, vector<128x128xf32>
    tpu.vector_store %arg12[%c0_27, %c0_28], %41 {strides = array<i32>} : memref<128x128xf32, #tpu.memory_space<vmem>>, vector<128x128xf32>,
    return
  }
  func.func @transform_0(%arg0: i32) -> (i32, i32) {
    %c0_i32 = arith.constant 0 : i32
    %c0_i32_0 = arith.constant 0 : i32
    return %arg0, %c0_i32 : i32, i32
  }
  func.func @transform_1(%arg0: i32) -> (i32, i32) {
    %c0_i32 = arith.constant 0 : i32
    %c0_i32_0 = arith.constant 0 : i32
    %c0_i32_1 = arith.constant 0 : i32
    return %c0_i32, %c0_i32_0 : i32, i32
  }
  func.func @transform_2(%arg0: i32) -> (i32, i32) {
    %c0_i32 = arith.constant 0 : i32
    %c0_i32_0 = arith.constant 0 : i32
    %c0_i32_1 = arith.constant 0 : i32
    return %c0_i32, %c0_i32_0 : i32, i32
  }
  func.func @transform_3(%arg0: i32) -> (i32, i32) {
    %c0_i32 = arith.constant 0 : i32
    %c0_i32_0 = arith.constant 0 : i32
    %c0_i32_1 = arith.constant 0 : i32
    return %c0_i32, %c0_i32_0 : i32, i32
  }
  func.func @transform_4(%arg0: i32) -> (i32, i32) {
    %c0_i32 = arith.constant 0 : i32
    %c0_i32_0 = arith.constant 0 : i32
    %c0_i32_1 = arith.constant 0 : i32
    return %c0_i32, %c0_i32_0 : i32, i32
  }
  func.func @transform_5(%arg0: i32) -> (i32, i32) {
    %c0_i32 = arith.constant 0 : i32
    %c0_i32_0 = arith.constant 0 : i32
    %c0_i32_1 = arith.constant 0 : i32
    return %c0_i32, %c0_i32_0 : i32, i32
  }
  func.func @transform_6(%arg0: i32) -> (i32, i32) {
    %c0_i32 = arith.constant 0 : i32
    %c0_i32_0 = arith.constant 0 : i32
    %c0_i32_1 = arith.constant 0 : i32
    return %c0_i32, %c0_i32_0 : i32, i32
  }
  func.func @transform_7(%arg0: i32) -> (i32, i32) {
    %c0_i32 = arith.constant 0 : i32
    %c0_i32_0 = arith.constant 0 : i32
    %c0_i32_1 = arith.constant 0 : i32
    return %c0_i32, %c0_i32_0 : i32, i32
  }
  func.func @transform_8(%arg0: i32) -> (i32, i32) {
    %c0_i32 = arith.constant 0 : i32
    %c0_i32_0 = arith.constant 0 : i32
    %c0_i32_1 = arith.constant 0 : i32
    return %c0_i32, %c0_i32_0 : i32, i32
  }
  func.func @transform_9(%arg0: i32) -> (i32, i32) {
    %c0_i32 = arith.constant 0 : i32
    %c0_i32_0 = arith.constant 0 : i32
    %c0_i32_1 = arith.constant 0 : i32
    return %c0_i32, %c0_i32_0 : i32, i32
  }
  func.func @transform_10(%arg0: i32) -> (i32, i32) {
    %c0_i32 = arith.constant 0 : i32
    %c0_i32_0 = arith.constant 0 : i32
    %c0_i32_1 = arith.constant 0 : i32
    return %c0_i32, %c0_i32_0 : i32, i32
  }
  func.func @transform_11(%arg0: i32) -> (i32, i32) {
    %c0_i32 = arith.constant 0 : i32
    %c0_i32_0 = arith.constant 0 : i32
    return %arg0, %c0_i32 : i32, i32
  }
}

module attributes {stable_mosaic.version = 11 : i64} {
  func.func @_mlp_kernel(%arg0: i32, %arg1: memref<128x128xf32, #tpu.memory_space<vmem>>, %arg2: memref<1x128xf32, #tpu.memory_space<vmem>>, %arg3: memref<1x128xf32, #tpu.memory_space<vmem>>, %arg4: memref<128x256xbf16, #tpu.memory_space<vmem>>, %arg5: memref<1x256xf32, #tpu.memory_space<vmem>>, %arg6: memref<256x128xbf16, #tpu.memory_space<vmem>>, %arg7: memref<1x128xf32, #tpu.memory_space<vmem>>, %arg8: memref<128x128xf32, #tpu.memory_space<vmem>>) attributes {dimension_semantics = [#tpu.dimension_semantics<parallel>], iteration_bounds = array<i64: 1>, scalar_prefetch = 0 : i64, scratch_operands = 0 : i64, tpu.core_type = #tpu.core_type<tc>, window_params = [{transform_indices = @transform_0, window_bounds = array<i64: 128, 128>}, {pipeline_mode = #tpu.pipeline_mode<synchronous>, transform_indices = @transform_1, window_bounds = array<i64: 1, 128>}, {pipeline_mode = #tpu.pipeline_mode<synchronous>, transform_indices = @transform_2, window_bounds = array<i64: 1, 128>}, {pipeline_mode = #tpu.pipeline_mode<synchronous>, transform_indices = @transform_3, window_bounds = array<i64: 128, 256>}, {pipeline_mode = #tpu.pipeline_mode<synchronous>, transform_indices = @transform_4, window_bounds = array<i64: 1, 256>}, {pipeline_mode = #tpu.pipeline_mode<synchronous>, transform_indices = @transform_5, window_bounds = array<i64: 256, 128>}, {pipeline_mode = #tpu.pipeline_mode<synchronous>, transform_indices = @transform_6, window_bounds = array<i64: 1, 128>}, {transform_indices = @transform_7, window_bounds = array<i64: 128, 128>}]} {
    %c0 = arith.constant 0 : index
    %c0_0 = arith.constant 0 : index
    %0 = vector.load %arg1[%c0, %c0_0] : memref<128x128xf32, #tpu.memory_space<vmem>>, vector<128x128xf32>
    %c0_1 = arith.constant 0 : index
    %c0_2 = arith.constant 0 : index
    %1 = vector.load %arg2[%c0_1, %c0_2] : memref<1x128xf32, #tpu.memory_space<vmem>>, vector<1x128xf32>
    %2 = vector.broadcast %1 : vector<1x128xf32> to vector<128x128xf32>
    %3 = arith.mulf %0, %2 : vector<128x128xf32>
    %c0_3 = arith.constant 0 : index
    %c0_4 = arith.constant 0 : index
    %4 = vector.load %arg3[%c0_3, %c0_4] : memref<1x128xf32, #tpu.memory_space<vmem>>, vector<1x128xf32>
    %5 = vector.broadcast %4 : vector<1x128xf32> to vector<128x128xf32>
    %6 = arith.addf %3, %5 : vector<128x128xf32>
    %7 = arith.truncf %6 : vector<128x128xf32> to vector<128x128xbf16>
    %c0_5 = arith.constant 0 : index
    %c0_6 = arith.constant 0 : index
    %8 = vector.load %arg4[%c0_5, %c0_6] : memref<128x256xbf16, #tpu.memory_space<vmem>>, vector<128x256xbf16>
    %cst = arith.constant dense<0.000000e+00> : vector<128x256xf32>
    %9 = tpu.matmul %7, %8, %cst {dimension_numbers = #tpu.dot_dimension_numbers<[1], [0], [0], [1], [0, 0, 1, 1], [], []>} : vector<128x128xbf16>, vector<128x256xbf16>, vector<128x256xf32> -> vector<128x256xf32>
    %c0_7 = arith.constant 0 : index
    %c0_8 = arith.constant 0 : index
    %10 = vector.load %arg5[%c0_7, %c0_8] : memref<1x256xf32, #tpu.memory_space<vmem>>, vector<1x256xf32>
    %11 = vector.broadcast %10 : vector<1x256xf32> to vector<128x256xf32>
    %12 = arith.addf %9, %11 : vector<128x256xf32>
    %cst_9 = arith.constant 5.000000e-01 : f32
    %13 = vector.broadcast %cst_9 : f32 to vector<128x256xf32>
    %14 = arith.mulf %13, %12 : vector<128x256xf32>
    %cst_10 = arith.constant 0.707106769 : f32
    %15 = vector.broadcast %cst_10 : f32 to vector<128x256xf32>
    %16 = arith.mulf %12, %15 : vector<128x256xf32>
    %17 = math.erf %16 : vector<128x256xf32>
    %cst_11 = arith.constant 1.000000e+00 : f32
    %18 = vector.broadcast %cst_11 : f32 to vector<128x256xf32>
    %19 = arith.addf %18, %17 : vector<128x256xf32>
    %20 = arith.mulf %14, %19 : vector<128x256xf32>
    %21 = arith.truncf %20 : vector<128x256xf32> to vector<128x256xbf16>
    %c0_12 = arith.constant 0 : index
    %c0_13 = arith.constant 0 : index
    %22 = vector.load %arg6[%c0_12, %c0_13] : memref<256x128xbf16, #tpu.memory_space<vmem>>, vector<256x128xbf16>
    %cst_14 = arith.constant dense<0.000000e+00> : vector<128x128xf32>
    %23 = tpu.matmul %21, %22, %cst_14 {dimension_numbers = #tpu.dot_dimension_numbers<[1], [0], [0], [1], [0, 0, 1, 1], [], []>} : vector<128x256xbf16>, vector<256x128xbf16>, vector<128x128xf32> -> vector<128x128xf32>
    %c0_15 = arith.constant 0 : index
    %c0_16 = arith.constant 0 : index
    %24 = vector.load %arg7[%c0_15, %c0_16] : memref<1x128xf32, #tpu.memory_space<vmem>>, vector<1x128xf32>
    %25 = vector.broadcast %24 : vector<1x128xf32> to vector<128x128xf32>
    %26 = arith.addf %23, %25 : vector<128x128xf32>
    %27 = arith.addf %26, %0 : vector<128x128xf32>
    %c0_17 = arith.constant 0 : index
    %c0_18 = arith.constant 0 : index
    %28 = vector.load %arg8[%c0_17, %c0_18] : memref<128x128xf32, #tpu.memory_space<vmem>>, vector<128x128xf32>
    tpu.vector_store %arg8[%c0_17, %c0_18], %27 {strides = array<i32>} : memref<128x128xf32, #tpu.memory_space<vmem>>, vector<128x128xf32>,
    return
  }
  func.func @transform_0(%arg0: i32) -> (i32, i32) {
    %c0_i32 = arith.constant 0 : i32
    %c0_i32_0 = arith.constant 0 : i32
    return %arg0, %c0_i32 : i32, i32
  }
  func.func @transform_1(%arg0: i32) -> (i32, i32) {
    %c0_i32 = arith.constant 0 : i32
    %c0_i32_0 = arith.constant 0 : i32
    %c0_i32_1 = arith.constant 0 : i32
    return %c0_i32, %c0_i32_0 : i32, i32
  }
  func.func @transform_2(%arg0: i32) -> (i32, i32) {
    %c0_i32 = arith.constant 0 : i32
    %c0_i32_0 = arith.constant 0 : i32
    %c0_i32_1 = arith.constant 0 : i32
    return %c0_i32, %c0_i32_0 : i32, i32
  }
  func.func @transform_3(%arg0: i32) -> (i32, i32) {
    %c0_i32 = arith.constant 0 : i32
    %c0_i32_0 = arith.constant 0 : i32
    %c0_i32_1 = arith.constant 0 : i32
    return %c0_i32, %c0_i32_0 : i32, i32
  }
  func.func @transform_4(%arg0: i32) -> (i32, i32) {
    %c0_i32 = arith.constant 0 : i32
    %c0_i32_0 = arith.constant 0 : i32
    %c0_i32_1 = arith.constant 0 : i32
    return %c0_i32, %c0_i32_0 : i32, i32
  }
  func.func @transform_5(%arg0: i32) -> (i32, i32) {
    %c0_i32 = arith.constant 0 : i32
    %c0_i32_0 = arith.constant 0 : i32
    %c0_i32_1 = arith.constant 0 : i32
    return %c0_i32, %c0_i32_0 : i32, i32
  }
  func.func @transform_6(%arg0: i32) -> (i32, i32) {
    %c0_i32 = arith.constant 0 : i32
    %c0_i32_0 = arith.constant 0 : i32
    %c0_i32_1 = arith.constant 0 : i32
    return %c0_i32, %c0_i32_0 : i32, i32
  }
  func.func @transform_7(%arg0: i32) -> (i32, i32) {
    %c0_i32 = arith.constant 0 : i32
    %c0_i32_0 = arith.constant 0 : i32
    return %arg0, %c0_i32 : i32, i32
  }
}

</mosaic_0001>

<bundles_post_ra>
// kernel: res_attention.4
= control target key start
LH: loop header
LB: loop body
LE: loop exit
PB: predicated region body
PF: predicated region fallthrough
CT: control target
= control target key end

     0   :  { %v164_v0 = vmov 0.0   ;;  %vm155_vm0 = vcmask 1040384   ;;  %s187_s1 = inlined_call_operand.vmem [shape: f32[2,128], index: 1, kind: output, shape index: {}]   ;;  %s188_s0 = inlined_call_operand.vmem [shape: f32[128,128], index: 0, kind: input, shape index: {}]  }
   0x1   :  { %12 = vst [vmem:[%s187_s1] sm:$0x3] %v164_v0  ;;  %v13_v1 = vld [vmem:[%s188_s0] sm:$0xff] }
   0x2   :  { %v111_v2 = vrot.slane %v13_v1, 4  ;;  %v117_v3 = vmul.f32 %v13_v1, %v13_v1 }
   0x4   :  { %v112_v4 = vadd.f32 %v111_v2, %v13_v1  ;;  %v148_v5 = vrot.slane %v117_v3, 4 }
   0x6   :  { %v113_v6 = vrot.slane %v112_v4, 2  ;;  %v149_v7 = vadd.f32 %v148_v5, %v117_v3 }
   0x8   :  { %v114_v8 = vadd.f32 %v113_v6, %v112_v4  ;;  %v150_v9 = vrot.slane %v149_v7, 2  ;;  %v154_v15 = vld [vmem:[%s187_s1] sm:$0x3] }
   0xa   :  { %v115_v10 = vrot.slane %v114_v8, 1  ;;  %v151_v11 = vadd.f32 %v150_v9, %v149_v7 }
   0xc   :  { %v116_v12 = vadd.f32 %v115_v10, %v114_v8  ;;  %v152_v13 = vrot.slane %v151_v11, 1 }
   0xe   :  { %v153_v14 = vadd.f32 %v152_v13, %v151_v11 }
  0x10   :  { %v156_v16 = vsel %vm155_vm0, %v116_v12, %v153_v14 }
  0x11   :  { %v157_v17 = vadd.f32 %v156_v16, %v154_v15 }
  0x13   :  { %158 = vst [vmem:[%s187_s1] sm:$0x3] %v157_v17 }

// kernel: res_attention.7
= control target key start
LH: loop header
LB: loop body
LE: loop exit
PB: predicated region body
PF: predicated region fallthrough
CT: control target
= control target key end

     0   :  { %v966_v1 = vmov 0   ;;  %s1469_s3 = inlined_call_operand.vmem [shape: bf16[128,256], index: 3, kind: input, shape index: {}]   ;;  %s1470_s0 = inlined_call_operand.vmem [shape: f32[128,128], index: 0, kind: input, shape index: {}]   ;;  %s1471_s1 = inlined_call_operand.vmem [shape: f32[1,128], index: 1, kind: input, shape index: {}]   ;;  %s1472_s2 = inlined_call_operand.vmem [shape: f32[1,128], index: 2, kind: input, shape index: {}]   ;;  %s1473_s5 = inlined_call_operand.vmem [shape: bf16[256,128], index: 5, kind: input, shape index: {}]   ;;  %s1474_s4 = inlined_call_operand.vmem [shape: f32[1,256], index: 4, kind: input, shape index: {}]   ;;  %s1475_s6 = inlined_call_operand.vmem [shape: f32[1,128], index: 6, kind: input, shape index: {}]   ;;  %s1476_s7 = inlined_call_operand.vmem [shape: f32[128,128], index: 7, kind: output, shape index: {}]  }
   0x1   :  { %v862_v0 = vld [vmem:[%s1469_s3 + $0x74] ss:$8 sps:$4 sm:$0xff]   ;;  %237 = vmatprep.mubr.bf16.mxu0 %v966_v1  ;;  %v864_v2 = vld [vmem:[%s1469_s3 + $0x70] ss:$8 sps:$4 sm:$0xff]   ;;  %v865_v3 = vld [vmem:[%s1469_s3 + $0x64] ss:$8 sps:$4 sm:$0xff]  }
   0x2   :  { %205 = vmatprep.subr.bf16.mxu0 %v862_v0  ;;  %v867_v4 = vld [vmem:[%s1469_s3 + $0x60] ss:$8 sps:$4 sm:$0xff]   ;;  %v868_v5 = vld [vmem:[%s1469_s3 + $0x54] ss:$8 sps:$4 sm:$0xff]   ;;  %v870_v6 = vld [vmem:[%s1469_s3 + $0x50] ss:$8 sps:$4 sm:$0xff]  }
   0x3   :  { %206 = vmatpush1.bf16.msra.mxu0 %v864_v2  ;;  %v871_v7 = vld [vmem:[%s1469_s3 + $0x44] ss:$8 sps:$4 sm:$0xff]   ;;  %v873_v8 = vld [vmem:[%s1469_s3 + $0x40] ss:$8 sps:$4 sm:$0xff]   ;;  %v874_v9 = vld [vmem:[%s1469_s3 + $0x34] ss:$8 sps:$4 sm:$0xff]  }
   0x4   :  { %207 = vmatprep.subr.bf16.mxu0 %v865_v3  ;;  %v876_v10 = vld [vmem:[%s1469_s3 + $0x30] ss:$8 sps:$4 sm:$0xff]   ;;  %v877_v11 = vld [vmem:[%s1469_s3 + $0x24] ss:$8 sps:$4 sm:$0xff]   ;;  %v879_v12 = vld [vmem:[%s1469_s3 + $0x20] ss:$8 sps:$4 sm:$0xff]  }
   0x5   :  { %v1047_v13 = vld [vmem:[%s1470_s0] sm:$0xff]  ;;  %v1052_v14 = vld [vmem:[%s1470_s0 + $0x8] sm:$0xff]  ;;  %v880_v16 = vld [vmem:[%s1469_s3 + $0x14] ss:$8 sps:$4 sm:$0xff]  }
   0x6   :  { %v1057_v15 = vld [vmem:[%s1471_s1] ss:$0 sm:$0xff]  ;;  %v882_v19 = vld [vmem:[%s1469_s3 + $0x10] ss:$8 sps:$4 sm:$0xff]   ;;  %v883_v21 = vld [vmem:[%s1469_s3 + $0x4] ss:$8 sps:$4 sm:$0xff]  }
   0x7   :  { %208 = vmatpush1.bf16.msra.mxu0 %v867_v4  ;;  %v50_v17 = vmul.f32 %v1057_v15, %v1047_v13  ;;  %v51_v18 = vmul.f32 %v1057_v15, %v1052_v14  ;;  %v1072_v20 = vld [vmem:[%s1472_s2] ss:$0 sm:$0xff]  ;;  %v1085_v25 = vld [vmem:[%s1470_s0 + $0x10] sm:$0xff]  ;;  %v1090_v26 = vld [vmem:[%s1470_s0 + $0x18] sm:$0xff] }
   0x8   :  { %209 = vmatprep.subr.bf16.mxu0 %v868_v5  ;;  %v885_v24 = vld [vmem:[%s1469_s3] ss:$8 sps:$4 sm:$0xff]   ;;  %v52_v28 = vmul.f32 %v1057_v15, %v1085_v25  ;;  %v53_v29 = vmul.f32 %v1057_v15, %v1090_v26  ;;  %v1119_v39 = vld [vmem:[%s1470_s0 + $0x30] sm:$0xff]  ;;  %v1124_v40 = vld [vmem:[%s1470_s0 + $0x38] sm:$0xff] }
   0x9   :  { %v73_v22 = vadd.f32 %v1072_v20, %v50_v17  ;;  %v74_v23 = vadd.f32 %v1072_v20, %v51_v18  ;;  %v1102_v32 = vld [vmem:[%s1470_s0 + $0x20] sm:$0xff]  ;;  %v1107_v33 = vld [vmem:[%s1470_s0 + $0x28] sm:$0xff]  ;;  %v56_v42 = vmul.f32 %v1057_v15, %v1119_v39  ;;  %v57_v43 = vmul.f32 %v1057_v15, %v1124_v40  ;;  %v1153_v53 = vld [vmem:[%s1470_s0 + $0x50] sm:$0xff] }
   0xa   :  { %v75_v30 = vadd.f32 %v1072_v20, %v52_v28  ;;  %v76_v31 = vadd.f32 %v1072_v20, %v53_v29  ;;  %v54_v35 = vmul.f32 %v1057_v15, %v1102_v32  ;;  %v55_v36 = vmul.f32 %v1057_v15, %v1107_v33  ;;  %v1136_v46 = vld [vmem:[%s1470_s0 + $0x40] sm:$0xff]  ;;  %v1141_v47 = vld [vmem:[%s1470_s0 + $0x48] sm:$0xff]  ;;  %v1158_v54 = vld [vmem:[%s1470_s0 + $0x58] sm:$0xff] }
   0xb   :  { %210 = vmatpush1.bf16.msra.mxu0 %v870_v6  ;;  %v89_v27 = vpack.c.bf16 %v74_v23, %v73_v22  ;;  %v79_v44 = vadd.f32 %v1072_v20, %v56_v42  ;;  %v80_v45 = vadd.f32 %v1072_v20, %v57_v43  ;;  %v58_v49 = vmul.f32 %v1057_v15, %v1136_v46  ;;  %v1170_v60 = vld [vmem:[%s1470_s0 + $0x60] sm:$0xff]  ;;  %v1175_v61 = vld [vmem:[%s1470_s0 + $0x68] sm:$0xff]  ;;  %v1187_v4 = vld [vmem:[%s1470_s0 + $0x70] sm:$0xff] }
   0xc   :  { %211 = vmatprep.subr.bf16.mxu0 %v871_v7  ;;  %v90_v34 = vpack.c.bf16 %v76_v31, %v75_v30  ;;  %v77_v37 = vadd.f32 %v1072_v20, %v54_v35  ;;  %v78_v38 = vadd.f32 %v1072_v20, %v55_v36  ;;  %v59_v50 = vmul.f32 %v1057_v15, %v1141_v47  ;;  %v1192_v5 = vld [vmem:[%s1470_s0 + $0x78] sm:$0xff]  ;;  %v890_v17 = vld [vmem:[%s1473_s5 + $0x68] sm:$0xff]   ;;  %v896_v23 = vld [vmem:[%s1473_s5 + $0x50] sm:$0xff]  }
   0xd   :  { %v92_v48 = vpack.c.bf16 %v80_v45, %v79_v44  ;;  %v81_v51 = vadd.f32 %v1072_v20, %v58_v49  ;;  %v60_v56 = vmul.f32 %v1057_v15, %v1153_v53  ;;  %v61_v57 = vmul.f32 %v1057_v15, %v1158_v54  ;;  %v891_v18 = vld [vmem:[%s1473_s5 + $0x28] sm:$0xff]   ;;  %v895_v22 = vld [vmem:[%s1473_s5 + $0x18] sm:$0xff]   ;;  %v900_v29 = vld [vmem:[%s1473_s5 + $0x40] sm:$0xff]  }
   0xe   :  { %v91_v41 = vpack.c.bf16 %v78_v38, %v77_v37  ;;  %v82_v52 = vadd.f32 %v1072_v20, %v59_v50  ;;  %v62_v63 = vmul.f32 %v1057_v15, %v1170_v60  ;;  %v63_v0 = vmul.f32 %v1057_v15, %v1175_v61  ;;  %v899_v28 = vld [vmem:[%s1473_s5 + $0x8] sm:$0xff]   ;;  %v901_v30 = vld [vmem:[%s1473_s5] sm:$0xff]  }
   0xf   :  { %212 = vmatpush1.bf16.msra.mxu0 %v873_v8  ;;  %v83_v58 = vadd.f32 %v1072_v20, %v60_v56  ;;  %v84_v59 = vadd.f32 %v1072_v20, %v61_v57  ;;  %v64_v7 = vmul.f32 %v1057_v15, %v1187_v4  ;;  %v65_v8 = vmul.f32 %v1057_v15, %v1192_v5  ;;  %v888_v15 = vld [vmem:[%s1473_s5 + $0x70] sm:$0xff]   ;;  %v113_v36 = vld [vmem:[%s1474_s4] sm:$0x3] }
  0x10   :  { %213 = vmatprep.subr.bf16.mxu0 %v874_v9  ;;  %v93_v55 = vpack.c.bf16 %v82_v52, %v81_v51  ;;  %v85_v2 = vadd.f32 %v1072_v20, %v62_v63  ;;  %v86_v3 = vadd.f32 %v1072_v20, %v63_v0  ;;  %v115_v31 = vlaneseq }
  0x11   :  { %v94_v62 = vpack.c.bf16 %v84_v59, %v83_v58  ;;  %v87_v9 = vadd.f32 %v1072_v20, %v64_v7 }
  0x12   :  { %v95_v6 = vpack.c.bf16 %v86_v3, %v85_v2 }
  0x13   :  { %214 = vmatpush1.bf16.msra.mxu0 %v876_v10  ;;  %v88_v10 = vadd.f32 %v1072_v20, %v65_v8  ;;  %v893_v20 = vld [vmem:[%s1473_s5 + $0x20] sm:$0xff]  }
  0x14   :  { %215 = vmatprep.subr.bf16.mxu0 %v877_v11 }
  0x15   :  { %v96_v11 = vpack.c.bf16 %v88_v10, %v87_v9 }
  0x17   :  { %216 = vmatpush1.bf16.msra.mxu0 %v879_v12  ;;  %v886_v12 = vld [vmem:[%s1473_s5 + $0x78] sm:$0xff]  }
  0x18   :  { %217 = vmatprep.subr.bf16.mxu0 %v880_v16  ;;  %v887_v16 = vld [vmem:[%s1473_s5 + $0x38] sm:$0xff]   ;;  %797 = vmatprep.subr.bf16.mxu1 %v886_v12 }
  0x19   :  { %798 = vmatpush3.bf16.msra.mxu1 %v887_v16 }
  0x1a   :  { %799 = vmatprep.subr.bf16.mxu1 %v888_v15 }
  0x1b   :  { %218 = vmatpush1.bf16.msra.mxu0 %v882_v19  ;;  %v892_v19 = vld [vmem:[%s1473_s5 + $0x60] sm:$0xff]  }
  0x1c   :  { %219 = vmatprep.subr.bf16.mxu0 %v883_v21  ;;  %v894_v21 = vld [vmem:[%s1473_s5 + $0x58] sm:$0xff]  }
  0x1f   :  { %220 = vmatpush1.bf16.msra.mxu0 %v885_v24  ;;  %v897_v24 = vld [vmem:[%s1473_s5 + $0x10] sm:$0xff]  }
  0x22   :  { %238 = vmatmul.mubr.bf16.vlgmr.msra.gmra.mxu0 %v89_v27  ;;  %v898_v27 = vld [vmem:[%s1473_s5 + $0x48] sm:$0xff]  }
  0x23   :  { %247 = vmatprep.mubr.bf16.mxu0 %v966_v1 }
  0x2a   :  { %248 = vmatmul.mubr.bf16.gmra.mxu0 %v90_v34  ;;  %v116_v34 = vshrl.u32 %v115_v31, 7 }
  0x2b   :  { %257 = vmatprep.mubr.bf16.mxu0 %v966_v1 }
  0x2c   :  { %v117_v35 = vsub.s32 0, %v116_v34  ;;  %v121_v37 = vsub.s32 1, %v116_v34 }
  0x2e   :  { %v1252_v38 = vrot.slane %v113_v36, %v117_v35 }
  0x32   :  { %258 = vmatmul.mubr.bf16.gmra.mxu0 %v91_v41  ;;  %v1254_v41 = vrot.slane %v113_v36, %v121_v37 }
  0x33   :  { %267 = vmatprep.mubr.bf16.mxu0 %v966_v1 }
  0x3a   :  { %268 = vmatmul.mubr.bf16.gmra.mxu0 %v92_v48 }
  0x3b   :  { %277 = vmatprep.mubr.bf16.mxu0 %v966_v1 }
  0x42   :  { %278 = vmatmul.mubr.bf16.gmra.mxu0 %v93_v55 }
  0x43   :  { %287 = vmatprep.mubr.bf16.mxu0 %v966_v1 }
  0x4a   :  { %288 = vmatmul.mubr.bf16.gmra.mxu0 %v94_v62 }
  0x4b   :  { %297 = vmatprep.mubr.bf16.mxu0 %v966_v1 }
  0x52   :  { %298 = vmatmul.mubr.bf16.gmra.mxu0 %v95_v6 }
  0x53   :  { %307 = vmatprep.mubr.bf16.mxu0 %v966_v1  ;;  %v889_v1 = vld [vmem:[%s1473_s5 + $0x30] sm:$0xff]  }
  0x54   :  { %800 = vmatpush3.bf16.msra.mxu1 %v889_v1 }
  0x55   :  { %801 = vmatprep.subr.bf16.mxu1 %v890_v17 }
  0x58   :  { %802 = vmatpush3.bf16.msra.mxu1 %v891_v18 }
  0x59   :  { %803 = vmatprep.subr.bf16.mxu1 %v892_v19 }
  0x5a   :  { %308 = vmatmul.mubr.bf16.gmra.mxu0 %v96_v11 }
  0x5c   :  { %804 = vmatpush3.bf16.msra.mxu1 %v893_v20 }
  0x5d   :  { %805 = vmatprep.subr.bf16.mxu1 %v894_v21 }
  0x60   :  { %806 = vmatpush3.bf16.msra.mxu1 %v895_v22 }
  0x61   :  { %807 = vmatprep.subr.bf16.mxu1 %v896_v23 }
  0x64   :  { %808 = vmatpush3.bf16.msra.mxu1 %v897_v24 }
  0x65   :  { %809 = vmatprep.subr.bf16.mxu1 %v898_v27 }
  0x68   :  { %810 = vmatpush3.bf16.msra.mxu1 %v899_v28 }
  0x69   :  { %811 = vmatprep.subr.bf16.mxu1 %v900_v29 }
  0x6c   :  { %812 = vmatpush3.bf16.msra.mxu1 %v901_v30 }
  0xe2   :  { %v239_v42 = vpop.f32.mrf.mxu0 }
  0xe3   :  { %v240_v43 = vadd.f32 %v239_v42, %v1252_v38 }
  0xe4   :  { %v241_v44 = vpop.f32.mrf.mxu0 }
  0xe5   :  { %v350_v45 = vmul.f32 0.70710677, %v240_v43  ;;  %v242_v48 = vadd.f32 %v241_v44, %v1254_v41 }
  0xe6   :  { %v243_v49 = vpop.f32.mrf.mxu0 }
  0xe7   :  { %v351_v50 = vmul.f32 0.70710677, %v242_v48  ;;  %v244_v51 = vadd.f32 %v243_v49, %v1252_v38  ;;  %902 = verf.f32 %v350_v45  ;;  %v319_v37 = vmul.f32 0.5, %v242_v48 }
  0xe8   :  { %v245_v52 = vpop.f32.mrf.mxu0 }
  0xe9   :  { %v352_v55 = vmul.f32 0.70710677, %v244_v51  ;;  %v246_v56 = vadd.f32 %v245_v52, %v1254_v41  ;;  %904 = verf.f32 %v351_v50  ;;  %v320_v35 = vmul.f32 0.5, %v244_v51 }
  0xea   :  { %v249_v57 = vpop.f32.mrf.mxu0  ;;  %v318_v50 = vmul.f32 0.5, %v240_v43 }
  0xeb   :  { %906 = verf.f32 %v352_v55  ;;  %v353_v58 = vmul.f32 0.70710677, %v246_v56  ;;  %v1261_v59 = vadd.f32 %v249_v57, %v1252_v38  ;;  %v321_v42 = vmul.f32 0.5, %v246_v56 }
  0xec   :  { %v251_v62 = vpop.f32.mrf.mxu0 }
  0xed   :  { %908 = verf.f32 %v353_v58  ;;  %v354_v63 = vmul.f32 0.70710677, %v1261_v59  ;;  %v1265_v0 = vadd.f32 %v251_v62, %v1254_v41 }
  0xee   :  { %v253_v2 = vpop.f32.mrf.mxu0 }
  0xef   :  { %v355_v3 = vmul.f32 0.70710677, %v1265_v0  ;;  %v254_v6 = vadd.f32 %v253_v2, %v1252_v38  ;;  %910 = verf.f32 %v354_v63 }
  0xf0   :  { %v255_v7 = vpop.f32.mrf.mxu0 }
  0xf1   :  { %v356_v8 = vmul.f32 0.70710677, %v254_v6  ;;  %v256_v9 = vadd.f32 %v255_v7, %v1254_v41  ;;  %912 = verf.f32 %v355_v3 }
  0xf2   :  { %v259_v10 = vpop.f32.mrf.mxu0 }
  0xf3   :  { %914 = verf.f32 %v356_v8  ;;  %v357_v11 = vmul.f32 0.70710677, %v256_v9  ;;  %v1271_v12 = vadd.f32 %v259_v10, %v1252_v38 }
  0xf4   :  { %v261_v16 = vpop.f32.mrf.mxu0  ;;  %v903_v1 = vpop.eup %902 }
  0xf5   :  { %916 = verf.f32 %v357_v11  ;;  %v358_v15 = vmul.f32 0.70710677, %v1271_v12  ;;  %v1275_v17 = vadd.f32 %v261_v16, %v1254_v41  ;;  %v414_v34 = vadd.f32 1.0, %v903_v1 }
  0xf6   :  { %v263_v18 = vpop.f32.mrf.mxu0  ;;  %v905_v19 = vpop.eup %904 }
  0xf7   :  { %v1278_v20 = vadd.f32 %v263_v18, %v1252_v38  ;;  %v359_v22 = vmul.f32 0.70710677, %v1275_v17  ;;  %918 = verf.f32 %v358_v15  ;;  %v415_v31 = vadd.f32 1.0, %v905_v19 }
  0xf8   :  { %v907_v21 = vpop.eup %906  ;;  %v265_v23 = vpop.f32.mrf.mxu0  ;;  %v446_v48 = vmul.f32 %v414_v34, %v318_v50  ;;  %v324_v18 = vmul.f32 0.5, %v254_v6 }
  0xf9   :  { %v416_v24 = vadd.f32 1.0, %v907_v21  ;;  %v360_v27 = vmul.f32 0.70710677, %v1278_v20  ;;  %v1283_v28 = vadd.f32 %v265_v23, %v1254_v41  ;;  %920 = verf.f32 %v359_v22 }
  0xfa   :  { %v909_v29 = vpop.eup %908  ;;  %v269_v30 = vpop.f32.mrf.mxu0  ;;  %v447_v62 = vmul.f32 %v415_v31, %v319_v37  ;;  %v325_v23 = vmul.f32 0.5, %v256_v9 }
  0xfb   :  { %922 = verf.f32 %v360_v27  ;;  %v361_v36 = vmul.f32 0.70710677, %v1283_v28  ;;  %v1287_v44 = vadd.f32 %v269_v30, %v1252_v38  ;;  %v417_v49 = vadd.f32 1.0, %v909_v29 }
  0xfc   :  { %v271_v45 = vpop.f32.mrf.mxu0  ;;  %v448_v52 = vmul.f32 %v416_v24, %v320_v35  ;;  %v911_v57 = vpop.eup %910  ;;  %v322_v29 = vmul.f32 0.5, %v1261_v59  ;;  %v323_v30 = vmul.f32 0.5, %v1265_v0 }
  0xfd   :  { %924 = verf.f32 %v361_v36  ;;  %v1290_v55 = vadd.f32 %v271_v45, %v1254_v41  ;;  %v362_v58 = vmul.f32 0.70710677, %v1287_v44  ;;  %v449_v63 = vmul.f32 %v417_v49, %v321_v42 }
  0xfe   :  { %v273_v51 = vpop.f32.mrf.mxu0  ;;  %v913_v2 = vpop.eup %912  ;;  %v478_v16 = vpack.c.bf16 %v448_v52, %v446_v48  ;;  %v418_v22 = vadd.f32 1.0, %v911_v57  ;;  %v328_v57 = vmul.f32 0.5, %v1278_v20 }
  0xff   :  { %v363_v56 = vmul.f32 0.70710677, %v1290_v55  ;;  %v1295_v7 = vadd.f32 %v273_v51, %v1252_v38  ;;  %v479_v8 = vpack.c.bf16 %v449_v63, %v447_v62  ;;  %v419_v1 = vadd.f32 1.0, %v913_v2 }
 0x100   :  { %v915_v3 = vpop.eup %914  ;;  %v275_v43 = vpop.f32.mrf.mxu0  ;;  %v450_v59 = vmul.f32 %v418_v22, %v322_v29 }
 0x101   :  { %v420_v10 = vadd.f32 1.0, %v915_v3  ;;  %926 = verf.f32 %v363_v56  ;;  %v1298_v11 = vadd.f32 %v275_v43, %v1254_v41  ;;  %v364_v19 = vmul.f32 0.70710677, %v1295_v7  ;;  %661 = vmatprep.mubr.bf16.mxu1 %v479_v8 }
 0x102   :  { %v917_v15 = vpop.eup %916  ;;  %928 = verf.f32 %v362_v58  ;;  %v279_v21 = vpop.f32.mrf.mxu0  ;;  %662 = vmatmul.mubr.bf16.vlgmr.msra.gmra.mxu1 %v478_v16  ;;  %v451_v37 = vmul.f32 %v419_v1, %v323_v30  ;;  %v329_v3 = vmul.f32 0.5, %v1283_v28  ;;  %v326_v28 = vmul.f32 0.5, %v1271_v12 }
 0x103   :  { %v421_v24 = vadd.f32 1.0, %v917_v15  ;;  %v365_v27 = vmul.f32 0.70710677, %v1298_v11  ;;  %930 = verf.f32 %v364_v19  ;;  %v1305_v31 = vadd.f32 %v279_v21, %v1252_v38 }
 0x104   :  { %v281_v6 = vpop.f32.mrf.mxu0  ;;  %v452_v34 = vmul.f32 %v420_v10, %v324_v18  ;;  %v919_v9 = vpop.eup %918  ;;  %v327_v15 = vmul.f32 0.5, %v1275_v17 }
 0x105   :  { %v453_v35 = vmul.f32 %v421_v24, %v325_v23  ;;  %932 = verf.f32 %v365_v27  ;;  %v1308_v36 = vadd.f32 %v281_v6, %v1254_v41  ;;  %v366_v42 = vmul.f32 0.70710677, %v1305_v31 }
 0x106   :  { %v283_v45 = vpop.f32.mrf.mxu0  ;;  %v921_v49 = vpop.eup %920  ;;  %v480_v2 = vpack.c.bf16 %v452_v34, %v450_v59  ;;  %v422_v10 = vadd.f32 1.0, %v919_v9  ;;  %v331_v34 = vmul.f32 0.5, %v1290_v55 }
 0x107   :  { %v367_v0 = vmul.f32 0.70710677, %v1308_v36  ;;  %v1313_v50 = vadd.f32 %v283_v45, %v1252_v38  ;;  %v481_v51 = vpack.c.bf16 %v453_v35, %v451_v37  ;;  %934 = verf.f32 %v366_v42 }
 0x108   :  { %v923_v52 = vpop.eup %922  ;;  %v285_v58 = vpop.f32.mrf.mxu0  ;;  %v423_v56 = vadd.f32 1.0, %v921_v49  ;;  %v454_v30 = vmul.f32 %v422_v10, %v326_v28  ;;  %v332_v45 = vmul.f32 0.5, %v1295_v7 }
 0x109   :  { %v424_v62 = vadd.f32 1.0, %v923_v52  ;;  %v368_v63 = vmul.f32 0.70710677, %v1313_v50  ;;  %936 = verf.f32 %v367_v0  ;;  %v1319_v43 = vadd.f32 %v285_v58, %v1254_v41  ;;  %669 = vmatprep.mubr.bf16.mxu1 %v481_v51 }
 0x10a   :  { %v925_v48 = vpop.eup %924  ;;  %v289_v8 = vpop.f32.mrf.mxu0  ;;  %670 = vmatmul.mubr.bf16.gmra.mxu1 %v480_v2  ;;  %v455_v24 = vmul.f32 %v423_v56, %v327_v15  ;;  %v333_v58 = vmul.f32 0.5, %v1298_v11  ;;  %v330_v2 = vmul.f32 0.5, %v1287_v44 }
 0x10b   :  { %v425_v16 = vadd.f32 1.0, %v925_v48  ;;  %938 = verf.f32 %v368_v63  ;;  %v1322_v20 = vadd.f32 %v289_v8, %v1252_v38  ;;  %v369_v1 = vmul.f32 0.70710677, %v1319_v43 }
 0x10c   :  { %v291_v18 = vpop.f32.mrf.mxu0  ;;  %v456_v19 = vmul.f32 %v424_v62, %v328_v57 }
 0x10d   :  { %v457_v21 = vmul.f32 %v425_v16, %v329_v3  ;;  %v1328_v22 = vadd.f32 %v291_v18, %v1254_v41  ;;  %940 = verf.f32 %v369_v1  ;;  %v370_v6 = vmul.f32 0.70710677, %v1322_v20 }
 0x10e   :  { %v927_v23 = vpop.eup %926  ;;  %v293_v27 = vpop.f32.mrf.mxu0  ;;  %v482_v59 = vpack.c.bf16 %v456_v19, %v454_v30 }
 0x10f   :  { %v929_v29 = vpop.eup %928  ;;  %v371_v17 = vmul.f32 0.70710677, %v1328_v22  ;;  %v427_v35 = vadd.f32 1.0, %v927_v23  ;;  %v1334_v12 = vadd.f32 %v293_v27, %v1252_v38  ;;  %v483_v37 = vpack.c.bf16 %v457_v21, %v455_v24 }
 0x110   :  { %v295_v9 = vpop.f32.mrf.mxu0  ;;  %v931_v42 = vpop.eup %930  ;;  %v426_v52 = vadd.f32 1.0, %v929_v29 }
 0x111   :  { %942 = verf.f32 %v371_v17  ;;  %v1338_v49 = vadd.f32 %v295_v9, %v1254_v41  ;;  %v428_v57 = vadd.f32 1.0, %v931_v42  ;;  %v372_v55 = vmul.f32 0.70710677, %v1334_v12  ;;  %677 = vmatprep.mubr.bf16.mxu1 %v483_v37 }
 0x112   :  { %v933_v0 = vpop.eup %932  ;;  %v299_v51 = vpop.f32.mrf.mxu0  ;;  %944 = verf.f32 %v370_v6  ;;  %678 = vmatmul.mubr.bf16.gmra.mxu1 %v482_v59  ;;  %v459_v48 = vmul.f32 %v427_v35, %v331_v34  ;;  %v458_v18 = vmul.f32 %v426_v52, %v330_v2  ;;  %v336_v9 = vmul.f32 0.5, %v1313_v50 }
 0x113   :  { %v429_v62 = vadd.f32 1.0, %v933_v0  ;;  %v373_v63 = vmul.f32 0.70710677, %v1338_v49  ;;  %v1344_v7 = vadd.f32 %v299_v51, %v1252_v38  ;;  %946 = verf.f32 %v372_v55 }
 0x114   :  { %v301_v56 = vpop.f32.mrf.mxu0  ;;  %v460_v3 = vmul.f32 %v428_v57, %v332_v45  ;;  %v935_v10 = vpop.eup %934  ;;  %v335_v42 = vmul.f32 0.5, %v1308_v36  ;;  %v337_v45 = vmul.f32 0.5, %v1319_v43  ;;  %v334_v57 = vmul.f32 0.5, %v1305_v31 }
 0x115   :  { %v461_v8 = vmul.f32 %v429_v62, %v333_v58  ;;  %948 = verf.f32 %v373_v63  ;;  %v374_v11 = vmul.f32 0.70710677, %v1344_v7  ;;  %v1349_v16 = vadd.f32 %v301_v56, %v1254_v41 }
 0x116   :  { %v303_v15 = vpop.f32.mrf.mxu0  ;;  %v937_v1 = vpop.eup %936  ;;  %v484_v29 = vpack.c.bf16 %v460_v3, %v458_v18  ;;  %v430_v35 = vadd.f32 1.0, %v935_v10  ;;  %v339_v43 = vmul.f32 0.5, %v1328_v22 }
 0x117   :  { %v1352_v28 = vadd.f32 %v303_v15, %v1252_v38  ;;  %v485_v19 = vpack.c.bf16 %v461_v8, %v459_v48  ;;  %v375_v21 = vmul.f32 0.70710677, %v1349_v16  ;;  %950 = verf.f32 %v374_v11 }
 0x118   :  { %v939_v44 = vpop.eup %938  ;;  %v305_v23 = vpop.f32.mrf.mxu0  ;;  %v431_v30 = vadd.f32 1.0, %v937_v1  ;;  %v462_v2 = vmul.f32 %v430_v35, %v334_v57  ;;  %v340_v15 = vmul.f32 0.5, %v1334_v12 }
 0x119   :  { %v432_v24 = vadd.f32 1.0, %v939_v44  ;;  %v376_v27 = vmul.f32 0.70710677, %v1352_v28  ;;  %685 = vmatprep.mubr.bf16.mxu1 %v485_v19  ;;  %952 = verf.f32 %v375_v21  ;;  %v1357_v6 = vadd.f32 %v305_v23, %v1254_v41 }
 0x11a   :  { %v309_v17 = vpop.f32.mrf.mxu0  ;;  %v941_v34 = vpop.eup %940  ;;  %686 = vmatmul.mubr.bf16.gmra.mxu1 %v484_v29  ;;  %v463_v51 = vmul.f32 %v431_v30, %v335_v42  ;;  %v341_v21 = vmul.f32 0.5, %v1338_v49 }
 0x11b   :  { %954 = verf.f32 %v376_v27  ;;  %v1361_v37 = vadd.f32 %v309_v17, %v1252_v38  ;;  %v433_v59 = vadd.f32 1.0, %v941_v34  ;;  %v377_v0 = vmul.f32 0.70710677, %v1357_v6 }
 0x11c   :  { %v311_v52 = vpop.f32.mrf.mxu0  ;;  %v464_v58 = vmul.f32 %v432_v24, %v336_v9  ;;  %v338_v27 = vmul.f32 0.5, %v1322_v20  ;;  %v343_v20 = vmul.f32 0.5, %v1349_v16  ;;  %v345_v57 = vmul.f32 0.5, %v1357_v6 }
 0x11d   :  { %v1368_v55 = vadd.f32 %v311_v52, %v1254_v41  ;;  %v465_v62 = vmul.f32 %v433_v59, %v337_v45  ;;  %956 = verf.f32 %v377_v0  ;;  %v378_v36 = vmul.f32 0.70710677, %v1361_v37 }
 0x11e   :  { %v943_v50 = vpop.eup %942  ;;  %v313_v63 = vpop.f32.mrf.mxu0  ;;  %v486_v18 = vpack.c.bf16 %v464_v58, %v462_v2  ;;  %v344_v52 = vmul.f32 0.5, %v1352_v28 }
 0x11f   :  { %v945_v48 = vpop.eup %944  ;;  %v379_v56 = vmul.f32 0.70710677, %v1368_v55  ;;  %v314_v3 = vadd.f32 %v313_v63, %v1252_v38  ;;  %v487_v8 = vpack.c.bf16 %v465_v62, %v463_v51  ;;  %v435_v10 = vadd.f32 1.0, %v943_v50 }
 0x120   :  { %v315_v31 = vpop.f32.mrf.mxu0  ;;  %v947_v11 = vpop.eup %946  ;;  %v434_v22 = vadd.f32 1.0, %v945_v48  ;;  %v342_v50 = vmul.f32 0.5, %v1344_v7  ;;  %v347_v28 = vmul.f32 0.5, %v1368_v55  ;;  %v346_v7 = vmul.f32 0.5, %v1361_v37  ;;  %v1387_v55 = vld [vmem:[%s1475_s6] ss:$0 sm:$0xff] }
 0x121   :  { %v316_v1 = vadd.f32 %v315_v31, %v1254_v41  ;;  %v436_v44 = vadd.f32 1.0, %v947_v11  ;;  %958 = verf.f32 %v379_v56  ;;  %v380_v23 = vmul.f32 0.70710677, %v314_v3  ;;  %693 = vmatprep.mubr.bf16.mxu1 %v487_v8 }
 0x122   :  { %v949_v19 = vpop.eup %948  ;;  %960 = verf.f32 %v378_v36  ;;  %694 = vmatmul.mubr.bf16.gmra.mxu1 %v486_v18  ;;  %v467_v29 = vmul.f32 %v435_v10, %v339_v43  ;;  %v466_v34 = vmul.f32 %v434_v22, %v338_v27  ;;  %v348_v6 = vmul.f32 0.5, %v314_v3 }
 0x123   :  { %v437_v24 = vadd.f32 1.0, %v949_v19  ;;  %v381_v38 = vmul.f32 0.70710677, %v316_v1  ;;  %962 = verf.f32 %v380_v23  ;;  %v468_v12 = vmul.f32 %v436_v44, %v340_v15 }
 0x124   :  { %v951_v41 = vpop.eup %950  ;;  %v349_v15 = vmul.f32 0.5, %v316_v1 }
 0x125   :  { %v469_v30 = vmul.f32 %v437_v24, %v341_v21  ;;  %964 = verf.f32 %v381_v38  ;;  %v488_v42 = vpack.c.bf16 %v468_v12, %v466_v34  ;;  %v438_v0 = vadd.f32 1.0, %v951_v41 }
 0x126   :  { %v953_v17 = vpop.eup %952 }
 0x127   :  { %v489_v35 = vpack.c.bf16 %v469_v30, %v467_v29  ;;  %v439_v45 = vadd.f32 1.0, %v953_v17  ;;  %v470_v36 = vmul.f32 %v438_v0, %v342_v50 }
 0x128   :  { %v955_v49 = vpop.eup %954 }
 0x129   :  { %v440_v9 = vadd.f32 1.0, %v955_v49  ;;  %701 = vmatprep.mubr.bf16.mxu1 %v489_v35  ;;  %v471_v62 = vmul.f32 %v439_v45, %v343_v20 }
 0x12a   :  { %v957_v59 = vpop.eup %956  ;;  %702 = vmatmul.mubr.bf16.gmra.mxu1 %v488_v42 }
 0x12b   :  { %v441_v58 = vadd.f32 1.0, %v957_v59  ;;  %v472_v51 = vmul.f32 %v440_v9, %v344_v52 }
 0x12d   :  { %v473_v63 = vmul.f32 %v441_v58, %v345_v57  ;;  %v490_v8 = vpack.c.bf16 %v472_v51, %v470_v36 }
 0x12e   :  { %v959_v2 = vpop.eup %958 }
 0x12f   :  { %v961_v48 = vpop.eup %960  ;;  %v491_v43 = vpack.c.bf16 %v473_v63, %v471_v62  ;;  %v443_v31 = vadd.f32 1.0, %v959_v2 }
 0x130   :  { %v963_v56 = vpop.eup %962  ;;  %v442_v16 = vadd.f32 1.0, %v961_v48 }
 0x131   :  { %v444_v10 = vadd.f32 1.0, %v963_v56  ;;  %709 = vmatprep.mubr.bf16.mxu1 %v491_v43  ;;  %v475_v19 = vmul.f32 %v443_v31, %v347_v28 }
 0x132   :  { %v965_v11 = vpop.eup %964  ;;  %710 = vmatmul.mubr.bf16.gmra.mxu1 %v490_v8  ;;  %v474_v23 = vmul.f32 %v442_v16, %v346_v7 }
 0x133   :  { %v445_v18 = vadd.f32 1.0, %v965_v11  ;;  %v476_v44 = vmul.f32 %v444_v10, %v348_v6 }
 0x135   :  { %v477_v21 = vmul.f32 %v445_v18, %v349_v15  ;;  %v492_v24 = vpack.c.bf16 %v476_v44, %v474_v23 }
 0x137   :  { %v493_v22 = vpack.c.bf16 %v477_v21, %v475_v19 }
 0x139   :  { %717 = vmatprep.mubr.bf16.mxu1 %v493_v22 }
 0x13a   :  { %718 = vmatmul.mubr.bf16.gmra.mxu1 %v492_v24 }
 0x1c2   :  { %v813_v38 = vpop.f32.mrf.mxu1 }
 0x1c4   :  { %v814_v3 = vpop.f32.mrf.mxu1 }
 0x1c5   :  { %v815_v1 = vadd.f32 %v814_v3, %v813_v38 }
 0x1c6   :  { %v816_v27 = vpop.f32.mrf.mxu1 }
 0x1c7   :  { %v664_v29 = vadd.f32 %v815_v1, %v1387_v55 }
 0x1c8   :  { %v817_v37 = vpop.f32.mrf.mxu1 }
 0x1c9   :  { %v726_v12 = vadd.f32 %v664_v29, %v1047_v13  ;;  %v818_v30 = vadd.f32 %v817_v37, %v816_v27 }
 0x1ca   :  { %v819_v41 = vpop.f32.mrf.mxu1 }
 0x1cb   :  { %742 = vst [vmem:[%s1476_s7] sm:$0xff] %v726_v12  ;;  %v667_v17 = vadd.f32 %v818_v30, %v1387_v55 }
 0x1cc   :  { %v820_v34 = vpop.f32.mrf.mxu1 }
 0x1cd   :  { %v727_v35 = vadd.f32 %v667_v17, %v1052_v14  ;;  %v821_v49 = vadd.f32 %v820_v34, %v819_v41 }
 0x1ce   :  { %v822_v9 = vpop.f32.mrf.mxu1 }
 0x1cf   :  { %743 = vst [vmem:[%s1476_s7 + $0x8] sm:$0xff] %v727_v35  ;;  %v672_v42 = vadd.f32 %v821_v49, %v1387_v55 }
 0x1d0   :  { %v823_v13 = vpop.f32.mrf.mxu1 }
 0x1d1   :  { %v728_v45 = vadd.f32 %v672_v42, %v1085_v25  ;;  %v824_v59 = vadd.f32 %v823_v13, %v822_v9 }
 0x1d2   :  { %v825_v0 = vpop.f32.mrf.mxu1 }
 0x1d3   :  { %744 = vst [vmem:[%s1476_s7 + $0x10] sm:$0xff] %v728_v45  ;;  %v675_v52 = vadd.f32 %v824_v59, %v1387_v55 }
 0x1d4   :  { %v826_v14 = vpop.f32.mrf.mxu1 }
 0x1d5   :  { %v729_v20 = vadd.f32 %v675_v52, %v1090_v26  ;;  %v827_v57 = vadd.f32 %v826_v14, %v825_v0 }
 0x1d6   :  { %v828_v58 = vpop.f32.mrf.mxu1 }
 0x1d7   :  { %745 = vst [vmem:[%s1476_s7 + $0x18] sm:$0xff] %v729_v20  ;;  %v680_v50 = vadd.f32 %v827_v57, %v1387_v55 }
 0x1d8   :  { %v829_v25 = vpop.f32.mrf.mxu1 }
 0x1d9   :  { %v730_v51 = vadd.f32 %v680_v50, %v1102_v32  ;;  %v830_v62 = vadd.f32 %v829_v25, %v828_v58 }
 0x1da   :  { %v831_v63 = vpop.f32.mrf.mxu1 }
 0x1db   :  { %746 = vst [vmem:[%s1476_s7 + $0x20] sm:$0xff] %v730_v51  ;;  %v683_v2 = vadd.f32 %v830_v62, %v1387_v55 }
 0x1dc   :  { %v832_v26 = vpop.f32.mrf.mxu1 }
 0x1dd   :  { %v731_v36 = vadd.f32 %v683_v2, %v1107_v33  ;;  %v833_v48 = vadd.f32 %v832_v26, %v831_v63 }
 0x1de   :  { %v834_v43 = vpop.f32.mrf.mxu1 }
 0x1df   :  { %747 = vst [vmem:[%s1476_s7 + $0x28] sm:$0xff] %v731_v36  ;;  %v688_v56 = vadd.f32 %v833_v48, %v1387_v55 }
 0x1e0   :  { %v835_v32 = vpop.f32.mrf.mxu1 }
 0x1e1   :  { %v732_v31 = vadd.f32 %v688_v56, %v1119_v39  ;;  %v836_v8 = vadd.f32 %v835_v32, %v834_v43 }
 0x1e2   :  { %v837_v11 = vpop.f32.mrf.mxu1 }
 0x1e3   :  { %748 = vst [vmem:[%s1476_s7 + $0x30] sm:$0xff] %v732_v31  ;;  %v691_v28 = vadd.f32 %v836_v8, %v1387_v55 }
 0x1e4   :  { %v838_v33 = vpop.f32.mrf.mxu1 }
 0x1e5   :  { %v733_v10 = vadd.f32 %v691_v28, %v1124_v40  ;;  %v839_v16 = vadd.f32 %v838_v33, %v837_v11 }
 0x1e6   :  { %v840_v6 = vpop.f32.mrf.mxu1 }
 0x1e7   :  { %749 = vst [vmem:[%s1476_s7 + $0x38] sm:$0xff] %v733_v10  ;;  %v696_v15 = vadd.f32 %v839_v16, %v1387_v55 }
 0x1e8   :  { %v841_v39 = vpop.f32.mrf.mxu1 }
 0x1e9   :  { %v734_v18 = vadd.f32 %v696_v15, %v1136_v46  ;;  %v842_v7 = vadd.f32 %v841_v39, %v840_v6 }
 0x1ea   :  { %v843_v19 = vpop.f32.mrf.mxu1 }
 0x1eb   :  { %750 = vst [vmem:[%s1476_s7 + $0x40] sm:$0xff] %v734_v18  ;;  %v699_v44 = vadd.f32 %v842_v7, %v1387_v55 }
 0x1ec   :  { %v844_v40 = vpop.f32.mrf.mxu1 }
 0x1ed   :  { %v735_v21 = vadd.f32 %v699_v44, %v1141_v47  ;;  %v845_v23 = vadd.f32 %v844_v40, %v843_v19 }
 0x1ee   :  { %v846_v22 = vpop.f32.mrf.mxu1 }
 0x1ef   :  { %751 = vst [vmem:[%s1476_s7 + $0x48] sm:$0xff] %v735_v21  ;;  %v704_v24 = vadd.f32 %v845_v23, %v1387_v55 }
 0x1f0   :  { %v847_v46 = vpop.f32.mrf.mxu1 }
 0x1f1   :  { %v736_v38 = vadd.f32 %v704_v24, %v1153_v53  ;;  %v848_v3 = vadd.f32 %v847_v46, %v846_v22 }
 0x1f2   :  { %v849_v1 = vpop.f32.mrf.mxu1 }
 0x1f3   :  { %752 = vst [vmem:[%s1476_s7 + $0x50] sm:$0xff] %v736_v38  ;;  %v707_v27 = vadd.f32 %v848_v3, %v1387_v55 }
 0x1f4   :  { %v850_v47 = vpop.f32.mrf.mxu1 }
 0x1f5   :  { %v737_v29 = vadd.f32 %v707_v27, %v1158_v54  ;;  %v851_v37 = vadd.f32 %v850_v47, %v849_v1 }
 0x1f6   :  { %v852_v12 = vpop.f32.mrf.mxu1 }
 0x1f7   :  { %753 = vst [vmem:[%s1476_s7 + $0x58] sm:$0xff] %v737_v29  ;;  %v712_v30 = vadd.f32 %v851_v37, %v1387_v55 }
 0x1f8   :  { %v853_v53 = vpop.f32.mrf.mxu1 }
 0x1f9   :  { %v738_v41 = vadd.f32 %v712_v30, %v1170_v60  ;;  %v854_v17 = vadd.f32 %v853_v53, %v852_v12 }
 0x1fa   :  { %v855_v34 = vpop.f32.mrf.mxu1 }
 0x1fb   :  { %754 = vst [vmem:[%s1476_s7 + $0x60] sm:$0xff] %v738_v41  ;;  %v715_v35 = vadd.f32 %v854_v17, %v1387_v55 }
 0x1fc   :  { %v856_v54 = vpop.f32.mrf.mxu1 }
 0x1fd   :  { %v739_v49 = vadd.f32 %v715_v35, %v1175_v61  ;;  %v857_v9 = vadd.f32 %v856_v54, %v855_v34 }
 0x1fe   :  { %v858_v42 = vpop.f32.mrf.mxu1 }
 0x1ff   :  { %755 = vst [vmem:[%s1476_s7 + $0x68] sm:$0xff] %v739_v49  ;;  %v720_v13 = vadd.f32 %v857_v9, %v1387_v55 }
 0x200   :  { %v859_v60 = vpop.f32.mrf.mxu1 }
 0x201   :  { %v740_v45 = vadd.f32 %v720_v13, %v1187_v4  ;;  %v860_v59 = vadd.f32 %v859_v60, %v858_v42 }
 0x203   :  { %756 = vst [vmem:[%s1476_s7 + $0x70] sm:$0xff] %v740_v45  ;;  %v723_v0 = vadd.f32 %v860_v59, %v1387_v55 }
 0x205   :  { %v741_v61 = vadd.f32 %v723_v0, %v1192_v5 }
 0x207   :  { %757 = vst [vmem:[%s1476_s7 + $0x78] sm:$0xff] %v741_v61 }

// kernel: res_attention.5
= control target key start
LH: loop header
LB: loop body
LE: loop exit
PB: predicated region body
PF: predicated region fallthrough
CT: control target
= control target key end

     0   :  { %v1492_v1 = vmov 0   ;;  %s2039_s3 = inlined_call_operand.vmem [shape: bf16[128,256], index: 3, kind: input, shape index: {}]   ;;  %s2040_s0 = inlined_call_operand.vmem [shape: f32[128,128], index: 0, kind: input, shape index: {}]   ;;  %s2041_s1 = inlined_call_operand.vmem [shape: f32[1,128], index: 1, kind: input, shape index: {}]   ;;  %s2042_s5 = inlined_call_operand.vmem [shape: bf16[256,128], index: 5, kind: input, shape index: {}]   ;;  %s2043_s2 = inlined_call_operand.vmem [shape: f32[1,128], index: 2, kind: input, shape index: {}]   ;;  %s2044_s7 = inlined_call_operand.vmem [shape: bf16[128,128], index: 7, kind: input, shape index: {}]   ;;  %s2045_s4 = inlined_call_operand.vmem [shape: f32[1,256], index: 4, kind: input, shape index: {}]   ;;  %s2046_s9 = inlined_call_operand.vmem [shape: bf16[128,128], index: 9, kind: input, shape index: {}]   ;;  %s2047_s6 = inlined_call_operand.vmem [shape: f32[1,128], index: 6, kind: input, shape index: {}]   ;;  %s2048_s8 = inlined_call_operand.vmem [shape: f32[1,128], index: 8, kind: input, shape index: {}]   ;;  %s2049_s10 = inlined_call_operand.vmem [shape: f32[1,128], index: 10, kind: input, shape index: {}]   ;;  %s2050_s11 = inlined_call_operand.vmem [shape: f32[128,128], index: 11, kind: output, shape index: {}]  }
   0x1   :  { %v1356_v0 = vld [vmem:[%s2039_s3 + $0x74] ss:$8 sps:$4 sm:$0xff]   ;;  %249 = vmatprep.mubr.bf16.mxu0 %v1492_v1  ;;  %v1358_v2 = vld [vmem:[%s2039_s3 + $0x70] ss:$8 sps:$4 sm:$0xff]   ;;  %v1359_v3 = vld [vmem:[%s2039_s3 + $0x64] ss:$8 sps:$4 sm:$0xff]  }
   0x2   :  { %217 = vmatprep.subr.bf16.mxu0 %v1356_v0  ;;  %v1361_v4 = vld [vmem:[%s2039_s3 + $0x60] ss:$8 sps:$4 sm:$0xff]   ;;  %v1362_v5 = vld [vmem:[%s2039_s3 + $0x54] ss:$8 sps:$4 sm:$0xff]   ;;  %v1364_v6 = vld [vmem:[%s2039_s3 + $0x50] ss:$8 sps:$4 sm:$0xff]  }
   0x3   :  { %218 = vmatpush1.bf16.msra.mxu0 %v1358_v2  ;;  %v1365_v7 = vld [vmem:[%s2039_s3 + $0x44] ss:$8 sps:$4 sm:$0xff]   ;;  %v1367_v8 = vld [vmem:[%s2039_s3 + $0x40] ss:$8 sps:$4 sm:$0xff]   ;;  %v1368_v9 = vld [vmem:[%s2039_s3 + $0x34] ss:$8 sps:$4 sm:$0xff]  }
   0x4   :  { %219 = vmatprep.subr.bf16.mxu0 %v1359_v3  ;;  %v1370_v10 = vld [vmem:[%s2039_s3 + $0x30] ss:$8 sps:$4 sm:$0xff]   ;;  %v1371_v11 = vld [vmem:[%s2039_s3 + $0x24] ss:$8 sps:$4 sm:$0xff]   ;;  %v1373_v12 = vld [vmem:[%s2039_s3 + $0x20] ss:$8 sps:$4 sm:$0xff]  }
   0x5   :  { %v39_v13 = vld [vmem:[%s2040_s0] sm:$0xff]  ;;  %v40_v14 = vld [vmem:[%s2040_s0 + $0x8] sm:$0xff]  ;;  %v1380_v16 = vld [vmem:[%s2042_s5 + $0x78] sm:$0xff]  }
   0x6   :  { %v1599_v15 = vld [vmem:[%s2041_s1] ss:$0 sm:$0xff]  ;;  %v1381_v17 = vld [vmem:[%s2042_s5 + $0x38] sm:$0xff]   ;;  %v1382_v18 = vld [vmem:[%s2042_s5 + $0x70] sm:$0xff]   ;;  %1195 = vmatprep.subr.bf16.mxu1 %v1380_v16 }
   0x7   :  { %220 = vmatpush1.bf16.msra.mxu0 %v1361_v4  ;;  %v1374_v19 = vld [vmem:[%s2039_s3 + $0x14] ss:$8 sps:$4 sm:$0xff]   ;;  %v1376_v20 = vld [vmem:[%s2039_s3 + $0x10] ss:$8 sps:$4 sm:$0xff]   ;;  %v1619_v21 = vld [vmem:[%s2043_s2] ss:$0 sm:$0xff]  ;;  %v62_v22 = vmul.f32 %v1599_v15, %v39_v13  ;;  %v63_v23 = vmul.f32 %v1599_v15, %v40_v14  ;;  %1196 = vmatpush3.bf16.msra.mxu1 %v1381_v17 }
   0x8   :  { %221 = vmatprep.subr.bf16.mxu0 %v1362_v5  ;;  %v1383_v24 = vld [vmem:[%s2042_s5 + $0x30] sm:$0xff]   ;;  %1197 = vmatprep.subr.bf16.mxu1 %v1382_v18  ;;  %v1384_v25 = vld [vmem:[%s2042_s5 + $0x68] sm:$0xff]   ;;  %v42_v29 = vld [vmem:[%s2040_s0 + $0x18] sm:$0xff] }
   0x9   :  { %v1377_v26 = vld [vmem:[%s2039_s3 + $0x4] ss:$8 sps:$4 sm:$0xff]   ;;  %v1379_v27 = vld [vmem:[%s2039_s3] ss:$8 sps:$4 sm:$0xff]   ;;  %v41_v28 = vld [vmem:[%s2040_s0 + $0x10] sm:$0xff]  ;;  %v85_v30 = vadd.f32 %v1619_v21, %v62_v22  ;;  %v86_v31 = vadd.f32 %v1619_v21, %v63_v23  ;;  %v65_v37 = vmul.f32 %v1599_v15, %v42_v29 }
   0xa   :  { %v1385_v32 = vld [vmem:[%s2042_s5 + $0x28] sm:$0xff]   ;;  %v1386_v33 = vld [vmem:[%s2042_s5 + $0x60] sm:$0xff]   ;;  %v64_v36 = vmul.f32 %v1599_v15, %v41_v28  ;;  %v1388_v38 = vld [vmem:[%s2042_s5 + $0x58] sm:$0xff]  }
   0xb   :  { %222 = vmatpush1.bf16.msra.mxu0 %v1364_v6  ;;  %1198 = vmatpush3.bf16.msra.mxu1 %v1383_v24  ;;  %v1387_v34 = vld [vmem:[%s2042_s5 + $0x20] sm:$0xff]   ;;  %v101_v35 = vpack.c.bf16 %v86_v31, %v85_v30  ;;  %v88_v40 = vadd.f32 %v1619_v21, %v65_v37  ;;  %v1389_v41 = vld [vmem:[%s2042_s5 + $0x18] sm:$0xff]   ;;  %v44_v43 = vld [vmem:[%s2040_s0 + $0x28] sm:$0xff]  ;;  %v127_v30 = vlaneseq }
   0xc   :  { %223 = vmatprep.subr.bf16.mxu0 %v1365_v7  ;;  %1199 = vmatprep.subr.bf16.mxu1 %v1384_v25  ;;  %v87_v39 = vadd.f32 %v1619_v21, %v64_v36  ;;  %v43_v42 = vld [vmem:[%s2040_s0 + $0x20] sm:$0xff]  ;;  %v67_v46 = vmul.f32 %v1599_v15, %v44_v43  ;;  %v45_v49 = vld [vmem:[%s2040_s0 + $0x30] sm:$0xff]  ;;  %v46_v50 = vld [vmem:[%s2040_s0 + $0x38] sm:$0xff] }
   0xd   :  { %v66_v45 = vmul.f32 %v1599_v15, %v43_v42  ;;  %v68_v52 = vmul.f32 %v1599_v15, %v45_v49  ;;  %v69_v53 = vmul.f32 %v1599_v15, %v46_v50  ;;  %v47_v56 = vld [vmem:[%s2040_s0 + $0x40] sm:$0xff]  ;;  %v48_v57 = vld [vmem:[%s2040_s0 + $0x48] sm:$0xff]  ;;  %v49_v63 = vld [vmem:[%s2040_s0 + $0x50] sm:$0xff]  ;;  %v128_v31 = vshrl.u32 %v127_v30, 7 }
   0xe   :  { %v102_v44 = vpack.c.bf16 %v88_v40, %v87_v39  ;;  %v90_v48 = vadd.f32 %v1619_v21, %v67_v46  ;;  %v70_v59 = vmul.f32 %v1599_v15, %v47_v56  ;;  %v71_v60 = vmul.f32 %v1599_v15, %v48_v57  ;;  %v50_v0 = vld [vmem:[%s2040_s0 + $0x58] sm:$0xff]  ;;  %v51_v7 = vld [vmem:[%s2040_s0 + $0x60] sm:$0xff]  ;;  %v53_v14 = vld [vmem:[%s2040_s0 + $0x70] sm:$0xff] }
   0xf   :  { %224 = vmatpush1.bf16.msra.mxu0 %v1367_v8  ;;  %1200 = vmatpush3.bf16.msra.mxu1 %v1385_v32  ;;  %v89_v47 = vadd.f32 %v1619_v21, %v66_v45  ;;  %v91_v54 = vadd.f32 %v1619_v21, %v68_v52  ;;  %v92_v55 = vadd.f32 %v1619_v21, %v69_v53  ;;  %v52_v8 = vld [vmem:[%s2040_s0 + $0x68] sm:$0xff]  ;;  %v54_v16 = vld [vmem:[%s2040_s0 + $0x78] sm:$0xff]  ;;  %v1390_v24 = vld [vmem:[%s2042_s5 + $0x50] sm:$0xff]   ;;  %v133_v32 = vsub.s32 1, %v128_v31 }
  0x10   :  { %225 = vmatprep.subr.bf16.mxu0 %v1368_v9  ;;  %1201 = vmatprep.subr.bf16.mxu1 %v1386_v33  ;;  %v93_v61 = vadd.f32 %v1619_v21, %v70_v59  ;;  %v94_v62 = vadd.f32 %v1619_v21, %v71_v60  ;;  %v72_v3 = vmul.f32 %v1599_v15, %v49_v63  ;;  %v1391_v25 = vld [vmem:[%s2042_s5 + $0x10] sm:$0xff]   ;;  %v1398_v29 = vld [vmem:[%s2044_s7 + $0x28] sm:$0xff]   ;;  %v129_v33 = vsub.s32 0, %v128_v31 }
  0x11   :  { %v103_v51 = vpack.c.bf16 %v90_v48, %v89_v47  ;;  %v104_v58 = vpack.c.bf16 %v92_v55, %v91_v54  ;;  %v73_v4 = vmul.f32 %v1599_v15, %v50_v0  ;;  %v76_v18 = vmul.f32 %v1599_v15, %v53_v14  ;;  %v1397_v28 = vld [vmem:[%s2044_s7 + $0x30] sm:$0xff]  }
  0x12   :  { %v105_v2 = vpack.c.bf16 %v94_v62, %v93_v61  ;;  %v95_v5 = vadd.f32 %v1619_v21, %v72_v3 }
  0x13   :  { %226 = vmatpush1.bf16.msra.mxu0 %v1370_v10  ;;  %1202 = vmatpush3.bf16.msra.mxu1 %v1387_v34  ;;  %v96_v6 = vadd.f32 %v1619_v21, %v73_v4  ;;  %v74_v10 = vmul.f32 %v1599_v15, %v51_v7  ;;  %v125_v34 = vld [vmem:[%s2045_s4] sm:$0x3] }
  0x14   :  { %227 = vmatprep.subr.bf16.mxu0 %v1371_v11  ;;  %1203 = vmatprep.subr.bf16.mxu1 %v1388_v38  ;;  %v75_v11 = vmul.f32 %v1599_v15, %v52_v8  ;;  %v1759_v36 = vrot.slane %v125_v34, %v133_v32  ;;  %v1761_v37 = vrot.slane %v125_v34, %v129_v33 }
  0x15   :  { %v106_v9 = vpack.c.bf16 %v96_v6, %v95_v5 }
  0x16   :  { %v98_v13 = vadd.f32 %v1619_v21, %v75_v11 }
  0x17   :  { %228 = vmatpush1.bf16.msra.mxu0 %v1373_v12  ;;  %1204 = vmatpush3.bf16.msra.mxu1 %v1389_v41  ;;  %v97_v12 = vadd.f32 %v1619_v21, %v74_v10 }
  0x18   :  { %229 = vmatprep.subr.bf16.mxu0 %v1374_v19  ;;  %v77_v19 = vmul.f32 %v1599_v15, %v54_v16  ;;  %1205 = vmatprep.subr.bf16.mxu1 %v1390_v24  ;;  %v1392_v15 = vld [vmem:[%s2042_s5 + $0x48] sm:$0xff]  }
  0x19   :  { %v107_v17 = vpack.c.bf16 %v98_v13, %v97_v12 }
  0x1a   :  { %v100_v22 = vadd.f32 %v1619_v21, %v77_v19 }
  0x1b   :  { %230 = vmatpush1.bf16.msra.mxu0 %v1376_v20  ;;  %v99_v20 = vadd.f32 %v1619_v21, %v76_v18  ;;  %1206 = vmatpush3.bf16.msra.mxu1 %v1391_v25  ;;  %v1394_v21 = vld [vmem:[%s2042_s5 + $0x40] sm:$0xff]  }
  0x1c   :  { %231 = vmatprep.subr.bf16.mxu0 %v1377_v26  ;;  %1207 = vmatprep.subr.bf16.mxu1 %v1392_v15  ;;  %v1395_v26 = vld [vmem:[%s2042_s5] sm:$0xff]  }
  0x1d   :  { %v108_v23 = vpack.c.bf16 %v100_v22, %v99_v20 }
  0x1f   :  { %232 = vmatpush1.bf16.msra.mxu0 %v1379_v27  ;;  %v1396_v27 = vld [vmem:[%s2044_s7 + $0x38] sm:$0xff]  }
  0x20   :  { %1291 = vmatprep.subr.bf16.mxu0 %v1396_v27 }
  0x22   :  { %250 = vmatmul.mubr.bf16.vlgmr.msra.gmra.mxu0 %v101_v35 }
  0x23   :  { %259 = vmatprep.mubr.bf16.mxu0 %v1492_v1  ;;  %1292 = vmatpush3.bf16.msra.mxu0 %v1396_v27 }
  0x24   :  { %1293 = vmatprep.subr.bf16.mxu0 %v1397_v28 }
  0x27   :  { %1294 = vmatpush3.bf16.msra.mxu0 %v1397_v28 }
  0x28   :  { %1295 = vmatprep.subr.bf16.mxu0 %v1398_v29 }
  0x2a   :  { %260 = vmatmul.mubr.bf16.gmra.mxu0 %v102_v44 }
  0x2b   :  { %269 = vmatprep.mubr.bf16.mxu0 %v1492_v1  ;;  %1296 = vmatpush3.bf16.msra.mxu0 %v1398_v29 }
  0x32   :  { %270 = vmatmul.mubr.bf16.gmra.mxu0 %v103_v51 }
  0x33   :  { %279 = vmatprep.mubr.bf16.mxu0 %v1492_v1 }
  0x3a   :  { %280 = vmatmul.mubr.bf16.gmra.mxu0 %v104_v58 }
  0x3b   :  { %289 = vmatprep.mubr.bf16.mxu0 %v1492_v1 }
  0x42   :  { %290 = vmatmul.mubr.bf16.gmra.mxu0 %v105_v2 }
  0x43   :  { %299 = vmatprep.mubr.bf16.mxu0 %v1492_v1 }
  0x4a   :  { %300 = vmatmul.mubr.bf16.gmra.mxu0 %v106_v9 }
  0x4b   :  { %309 = vmatprep.mubr.bf16.mxu0 %v1492_v1 }
  0x52   :  { %310 = vmatmul.mubr.bf16.gmra.mxu0 %v107_v17 }
  0x53   :  { %319 = vmatprep.mubr.bf16.mxu0 %v1492_v1  ;;  %v1393_v1 = vld [vmem:[%s2042_s5 + $0x8] sm:$0xff]  }
  0x54   :  { %1208 = vmatpush3.bf16.msra.mxu1 %v1393_v1 }
  0x55   :  { %1209 = vmatprep.subr.bf16.mxu1 %v1394_v21 }
  0x58   :  { %1210 = vmatpush3.bf16.msra.mxu1 %v1395_v26 }
  0x5a   :  { %320 = vmatmul.mubr.bf16.gmra.mxu0 %v108_v23 }
  0xe2   :  { %v251_v35 = vpop.f32.mrf.mxu0 }
  0xe3   :  { %v252_v42 = vadd.f32 %v251_v35, %v1761_v37 }
  0xe4   :  { %v253_v38 = vpop.f32.mrf.mxu0 }
  0xe5   :  { %v254_v40 = vadd.f32 %v253_v38, %v1759_v36  ;;  %v330_v49 = vmax.f32 %v252_v42, 0.0 }
  0xe6   :  { %v255_v39 = vpop.f32.mrf.mxu0 }
  0xe7   :  { %v256_v41 = vadd.f32 %v255_v39, %v1761_v37  ;;  %v331_v47 = vmax.f32 %v254_v40, 0.0 }
  0xe8   :  { %v257_v43 = vpop.f32.mrf.mxu0 }
  0xe9   :  { %v258_v44 = vadd.f32 %v257_v43, %v1759_v36  ;;  %v332_v45 = vmax.f32 %v256_v41, 0.0 }
  0xea   :  { %v261_v46 = vpop.f32.mrf.mxu0 }
  0xeb   :  { %v333_v48 = vmax.f32 %v258_v44, 0.0  ;;  %v362_v52 = vpack.c.bf16 %v332_v45, %v330_v49  ;;  %v262_v56 = vadd.f32 %v261_v46, %v1761_v37 }
  0xec   :  { %v263_v50 = vpop.f32.mrf.mxu0 }
  0xed   :  { %v363_v51 = vpack.c.bf16 %v333_v48, %v331_v47  ;;  %v264_v54 = vadd.f32 %v263_v50, %v1759_v36  ;;  %v334_v63 = vmax.f32 %v262_v56, 0.0 }
  0xee   :  { %v265_v53 = vpop.f32.mrf.mxu0 }
  0xef   :  { %v266_v55 = vadd.f32 %v265_v53, %v1761_v37  ;;  %545 = vmatprep.mubr.bf16.mxu1 %v363_v51  ;;  %v335_v61 = vmax.f32 %v264_v54, 0.0 }
  0xf0   :  { %v267_v57 = vpop.f32.mrf.mxu0  ;;  %546 = vmatmul.mubr.bf16.vlgmr.msra.gmra.mxu1 %v362_v52 }
  0xf1   :  { %v268_v58 = vadd.f32 %v267_v57, %v1759_v36  ;;  %v336_v59 = vmax.f32 %v266_v55, 0.0 }
  0xf2   :  { %v271_v60 = vpop.f32.mrf.mxu0 }
  0xf3   :  { %v337_v62 = vmax.f32 %v268_v58, 0.0  ;;  %v364_v3 = vpack.c.bf16 %v336_v59, %v334_v63  ;;  %v272_v7 = vadd.f32 %v271_v60, %v1761_v37 }
  0xf4   :  { %v273_v0 = vpop.f32.mrf.mxu0 }
  0xf5   :  { %v365_v2 = vpack.c.bf16 %v337_v62, %v335_v61  ;;  %v274_v5 = vadd.f32 %v273_v0, %v1759_v36  ;;  %v338_v14 = vmax.f32 %v272_v7, 0.0 }
  0xf6   :  { %v275_v4 = vpop.f32.mrf.mxu0 }
  0xf7   :  { %v276_v6 = vadd.f32 %v275_v4, %v1761_v37  ;;  %553 = vmatprep.mubr.bf16.mxu1 %v365_v2  ;;  %v339_v12 = vmax.f32 %v274_v5, 0.0 }
  0xf8   :  { %v277_v8 = vpop.f32.mrf.mxu0  ;;  %554 = vmatmul.mubr.bf16.gmra.mxu1 %v364_v3 }
  0xf9   :  { %v278_v9 = vadd.f32 %v277_v8, %v1759_v36  ;;  %v340_v10 = vmax.f32 %v276_v6, 0.0 }
  0xfa   :  { %v281_v11 = vpop.f32.mrf.mxu0 }
  0xfb   :  { %v341_v13 = vmax.f32 %v278_v9, 0.0  ;;  %v366_v18 = vpack.c.bf16 %v340_v10, %v338_v14  ;;  %v282_v23 = vadd.f32 %v281_v11, %v1761_v37 }
  0xfc   :  { %v283_v16 = vpop.f32.mrf.mxu0 }
  0xfd   :  { %v367_v17 = vpack.c.bf16 %v341_v13, %v339_v12  ;;  %v284_v20 = vadd.f32 %v283_v16, %v1759_v36  ;;  %v342_v27 = vmax.f32 %v282_v23, 0.0 }
  0xfe   :  { %v285_v19 = vpop.f32.mrf.mxu0 }
  0xff   :  { %v286_v22 = vadd.f32 %v285_v19, %v1761_v37  ;;  %561 = vmatprep.mubr.bf16.mxu1 %v367_v17  ;;  %v343_v21 = vmax.f32 %v284_v20, 0.0 }
 0x100   :  { %v287_v24 = vpop.f32.mrf.mxu0  ;;  %562 = vmatmul.mubr.bf16.gmra.mxu1 %v366_v18 }
 0x101   :  { %v288_v25 = vadd.f32 %v287_v24, %v1759_v36  ;;  %v344_v15 = vmax.f32 %v286_v22, 0.0 }
 0x102   :  { %v291_v1 = vpop.f32.mrf.mxu0 }
 0x103   :  { %v345_v26 = vmax.f32 %v288_v25, 0.0  ;;  %v368_v30 = vpack.c.bf16 %v344_v15, %v342_v27  ;;  %v292_v34 = vadd.f32 %v291_v1, %v1761_v37  ;;  %v1399_v15 = vld [vmem:[%s2044_s7 + $0x20] sm:$0xff]   ;;  %v1402_v1 = vld [vmem:[%s2044_s7 + $0x8] sm:$0xff]   ;;  %v1405_v27 = vld [vmem:[%s2046_s9 + $0x30] sm:$0xff]  }
 0x104   :  { %v293_v28 = vpop.f32.mrf.mxu0  ;;  %1297 = vmatprep.subr.bf16.mxu0 %v1399_v15 }
 0x105   :  { %v369_v29 = vpack.c.bf16 %v345_v26, %v343_v21  ;;  %v294_v32 = vadd.f32 %v293_v28, %v1759_v36  ;;  %v346_v43 = vmax.f32 %v292_v34, 0.0  ;;  %1298 = vmatpush3.bf16.msra.mxu0 %v1399_v15  ;;  %v1403_v21 = vld [vmem:[%s2044_s7] sm:$0xff]   ;;  %v1404_v26 = vld [vmem:[%s2046_s9 + $0x38] sm:$0xff]   ;;  %v1406_v28 = vld [vmem:[%s2046_s9 + $0x28] sm:$0xff]  }
 0x106   :  { %v295_v31 = vpop.f32.mrf.mxu0  ;;  %1323 = vmatprep.subr.bf16.mxu1 %v1404_v26 }
 0x107   :  { %v296_v33 = vadd.f32 %v295_v31, %v1761_v37  ;;  %569 = vmatprep.mubr.bf16.mxu1 %v369_v29  ;;  %v347_v41 = vmax.f32 %v294_v32, 0.0  ;;  %1324 = vmatpush3.bf16.msra.mxu1 %v1404_v26  ;;  %v1407_v29 = vld [vmem:[%s2046_s9 + $0x20] sm:$0xff]  }
 0x108   :  { %v297_v35 = vpop.f32.mrf.mxu0  ;;  %570 = vmatmul.mubr.bf16.gmra.mxu1 %v368_v30  ;;  %1325 = vmatprep.subr.bf16.mxu1 %v1405_v27  ;;  %v1408_v30 = vld [vmem:[%s2046_s9 + $0x18] sm:$0xff]  }
 0x109   :  { %v298_v38 = vadd.f32 %v297_v35, %v1759_v36  ;;  %v348_v39 = vmax.f32 %v296_v33, 0.0  ;;  %v1828_v35 = vld [vmem:[%s2047_s6] ss:$0 sm:$0xff] }
 0x10a   :  { %v301_v40 = vpop.f32.mrf.mxu0 }
 0x10b   :  { %v349_v42 = vmax.f32 %v298_v38, 0.0  ;;  %v370_v46 = vpack.c.bf16 %v348_v39, %v346_v43  ;;  %v302_v50 = vadd.f32 %v301_v40, %v1761_v37  ;;  %1326 = vmatpush3.bf16.msra.mxu1 %v1405_v27 }
 0x10c   :  { %v303_v44 = vpop.f32.mrf.mxu0  ;;  %1327 = vmatprep.subr.bf16.mxu1 %v1406_v28 }
 0x10d   :  { %v371_v45 = vpack.c.bf16 %v349_v42, %v347_v41  ;;  %v304_v48 = vadd.f32 %v303_v44, %v1759_v36  ;;  %v350_v57 = vmax.f32 %v302_v50, 0.0 }
 0x10e   :  { %v305_v47 = vpop.f32.mrf.mxu0 }
 0x10f   :  { %v306_v49 = vadd.f32 %v305_v47, %v1761_v37  ;;  %577 = vmatprep.mubr.bf16.mxu1 %v371_v45  ;;  %v351_v55 = vmax.f32 %v304_v48, 0.0  ;;  %1328 = vmatpush3.bf16.msra.mxu1 %v1406_v28 }
 0x110   :  { %v307_v51 = vpop.f32.mrf.mxu0  ;;  %578 = vmatmul.mubr.bf16.gmra.mxu1 %v370_v46  ;;  %1329 = vmatprep.subr.bf16.mxu1 %v1407_v29 }
 0x111   :  { %v308_v52 = vadd.f32 %v307_v51, %v1759_v36  ;;  %v352_v53 = vmax.f32 %v306_v49, 0.0 }
 0x112   :  { %v311_v54 = vpop.f32.mrf.mxu0 }
 0x113   :  { %v353_v56 = vmax.f32 %v308_v52, 0.0  ;;  %v372_v60 = vpack.c.bf16 %v352_v53, %v350_v57  ;;  %v312_v0 = vadd.f32 %v311_v54, %v1761_v37  ;;  %1330 = vmatpush3.bf16.msra.mxu1 %v1407_v29 }
 0x114   :  { %v313_v58 = vpop.f32.mrf.mxu0  ;;  %1331 = vmatprep.subr.bf16.mxu1 %v1408_v30 }
 0x115   :  { %v373_v59 = vpack.c.bf16 %v353_v56, %v351_v55  ;;  %v314_v62 = vadd.f32 %v313_v58, %v1759_v36  ;;  %v354_v8 = vmax.f32 %v312_v0, 0.0 }
 0x116   :  { %v315_v61 = vpop.f32.mrf.mxu0 }
 0x117   :  { %v316_v63 = vadd.f32 %v315_v61, %v1761_v37  ;;  %585 = vmatprep.mubr.bf16.mxu1 %v373_v59  ;;  %v355_v6 = vmax.f32 %v314_v62, 0.0  ;;  %1332 = vmatpush3.bf16.msra.mxu1 %v1408_v30 }
 0x118   :  { %v317_v2 = vpop.f32.mrf.mxu0  ;;  %586 = vmatmul.mubr.bf16.gmra.mxu1 %v372_v60 }
 0x119   :  { %v318_v3 = vadd.f32 %v317_v2, %v1759_v36  ;;  %v356_v4 = vmax.f32 %v316_v63, 0.0 }
 0x11a   :  { %v321_v5 = vpop.f32.mrf.mxu0 }
 0x11b   :  { %v357_v7 = vmax.f32 %v318_v3, 0.0  ;;  %v374_v11 = vpack.c.bf16 %v356_v4, %v354_v8  ;;  %v322_v16 = vadd.f32 %v321_v5, %v1761_v37 }
 0x11c   :  { %v323_v9 = vpop.f32.mrf.mxu0 }
 0x11d   :  { %v375_v10 = vpack.c.bf16 %v357_v7, %v355_v6  ;;  %v324_v13 = vadd.f32 %v323_v9, %v1759_v36  ;;  %v358_v23 = vmax.f32 %v322_v16, 0.0 }
 0x11e   :  { %v325_v12 = vpop.f32.mrf.mxu0 }
 0x11f   :  { %v326_v14 = vadd.f32 %v325_v12, %v1761_v37  ;;  %593 = vmatprep.mubr.bf16.mxu1 %v375_v10  ;;  %v359_v20 = vmax.f32 %v324_v13, 0.0  ;;  %v1400_v37 = vld [vmem:[%s2044_s7 + $0x18] sm:$0xff]  }
 0x120   :  { %v327_v17 = vpop.f32.mrf.mxu0  ;;  %594 = vmatmul.mubr.bf16.gmra.mxu1 %v374_v11  ;;  %1299 = vmatprep.subr.bf16.mxu0 %v1400_v37 }
 0x121   :  { %v328_v18 = vadd.f32 %v327_v17, %v1759_v36  ;;  %v360_v19 = vmax.f32 %v326_v14, 0.0  ;;  %1300 = vmatpush3.bf16.msra.mxu0 %v1400_v37  ;;  %v1401_v36 = vld [vmem:[%s2044_s7 + $0x10] sm:$0xff]  }
 0x122   :  { %1301 = vmatprep.subr.bf16.mxu0 %v1401_v36 }
 0x123   :  { %v361_v22 = vmax.f32 %v328_v18, 0.0  ;;  %v376_v25 = vpack.c.bf16 %v360_v19, %v358_v23 }
 0x125   :  { %v377_v24 = vpack.c.bf16 %v361_v22, %v359_v20  ;;  %1302 = vmatpush3.bf16.msra.mxu0 %v1401_v36 }
 0x126   :  { %1303 = vmatprep.subr.bf16.mxu0 %v1402_v1 }
 0x127   :  { %601 = vmatprep.mubr.bf16.mxu1 %v377_v24 }
 0x128   :  { %602 = vmatmul.mubr.bf16.gmra.mxu1 %v376_v25 }
 0x129   :  { %1304 = vmatpush3.bf16.msra.mxu0 %v1402_v1 }
 0x12a   :  { %1305 = vmatprep.subr.bf16.mxu0 %v1403_v21 }
 0x12d   :  { %1306 = vmatpush3.bf16.msra.mxu0 %v1403_v21 }
 0x1b0   :  { %v1211_v31 = vpop.f32.mrf.mxu1 }
 0x1b2   :  { %v1212_v32 = vpop.f32.mrf.mxu1 }
 0x1b3   :  { %v1213_v34 = vadd.f32 %v1212_v32, %v1211_v31 }
 0x1b4   :  { %v1214_v33 = vpop.f32.mrf.mxu1 }
 0x1b5   :  { %v1831_v41 = vadd.f32 %v1213_v34, %v1828_v35 }
 0x1b6   :  { %v1215_v38 = vpop.f32.mrf.mxu1 }
 0x1b7   :  { %v1216_v39 = vadd.f32 %v1215_v38, %v1214_v33 }
 0x1b8   :  { %v1217_v40 = vpop.f32.mrf.mxu1 }
 0x1b9   :  { %v1834_v42 = vadd.f32 %v1216_v39, %v1828_v35 }
 0x1ba   :  { %v1218_v43 = vpop.f32.mrf.mxu1 }
 0x1bb   :  { %v610_v44 = vpack.c.bf16 %v1834_v42, %v1831_v41  ;;  %v1219_v46 = vadd.f32 %v1218_v43, %v1217_v40 }
 0x1bc   :  { %v1220_v45 = vpop.f32.mrf.mxu1 }
 0x1bd   :  { %1307 = vmatprep.mubr.bf16.mxu0 %v610_v44  ;;  %v1839_v50 = vadd.f32 %v1219_v46, %v1828_v35  ;;  %v1410_v46 = vld [vmem:[%s2046_s9 + $0x8] sm:$0xff]  }
 0x1be   :  { %v1221_v47 = vpop.f32.mrf.mxu1 }
 0x1bf   :  { %v1222_v48 = vadd.f32 %v1221_v47, %v1220_v45  ;;  %v1409_v45 = vld [vmem:[%s2046_s9 + $0x10] sm:$0xff]  }
 0x1c0   :  { %v1223_v49 = vpop.f32.mrf.mxu1  ;;  %1333 = vmatprep.subr.bf16.mxu1 %v1409_v45 }
 0x1c1   :  { %v1842_v51 = vadd.f32 %v1222_v48, %v1828_v35  ;;  %1334 = vmatpush3.bf16.msra.mxu1 %v1409_v45 }
 0x1c2   :  { %v1224_v52 = vpop.f32.mrf.mxu1  ;;  %1335 = vmatprep.subr.bf16.mxu1 %v1410_v46 }
 0x1c3   :  { %v611_v53 = vpack.c.bf16 %v1842_v51, %v1839_v50  ;;  %v1225_v55 = vadd.f32 %v1224_v52, %v1223_v49  ;;  %v1161_v49 = vld [vmem:[%s2048_s8] ss:$0 sm:$0xff] }
 0x1c4   :  { %v1226_v54 = vpop.f32.mrf.mxu1 }
 0x1c5   :  { %1308 = vmatmul.mubr.bf16.vlgmr.msra.gmra.mxu0 %v611_v53  ;;  %v1847_v59 = vadd.f32 %v1225_v55, %v1828_v35  ;;  %1336 = vmatpush3.bf16.msra.mxu1 %v1410_v46 }
 0x1c6   :  { %v1227_v56 = vpop.f32.mrf.mxu1 }
 0x1c7   :  { %v1228_v57 = vadd.f32 %v1227_v56, %v1226_v54 }
 0x1c8   :  { %v1229_v58 = vpop.f32.mrf.mxu1 }
 0x1c9   :  { %v1850_v60 = vadd.f32 %v1228_v57, %v1828_v35 }
 0x1ca   :  { %v1230_v61 = vpop.f32.mrf.mxu1 }
 0x1cb   :  { %v612_v62 = vpack.c.bf16 %v1850_v60, %v1847_v59  ;;  %v1231_v0 = vadd.f32 %v1230_v61, %v1229_v58 }
 0x1cc   :  { %v1232_v63 = vpop.f32.mrf.mxu1 }
 0x1cd   :  { %1311 = vmatprep.mubr.bf16.mxu0 %v612_v62  ;;  %v1855_v5 = vadd.f32 %v1231_v0, %v1828_v35 }
 0x1ce   :  { %v1233_v2 = vpop.f32.mrf.mxu1 }
 0x1cf   :  { %v1234_v3 = vadd.f32 %v1233_v2, %v1232_v63 }
 0x1d0   :  { %v1235_v4 = vpop.f32.mrf.mxu1 }
 0x1d1   :  { %v1858_v6 = vadd.f32 %v1234_v3, %v1828_v35 }
 0x1d2   :  { %v1236_v7 = vpop.f32.mrf.mxu1 }
 0x1d3   :  { %v613_v8 = vpack.c.bf16 %v1858_v6, %v1855_v5  ;;  %v1237_v10 = vadd.f32 %v1236_v7, %v1235_v4 }
 0x1d4   :  { %v1238_v9 = vpop.f32.mrf.mxu1 }
 0x1d5   :  { %1312 = vmatmul.mubr.bf16.gmra.mxu0 %v613_v8  ;;  %v1863_v14 = vadd.f32 %v1237_v10, %v1828_v35 }
 0x1d6   :  { %v1239_v11 = vpop.f32.mrf.mxu1 }
 0x1d7   :  { %v1240_v12 = vadd.f32 %v1239_v11, %v1238_v9 }
 0x1d8   :  { %v1241_v13 = vpop.f32.mrf.mxu1 }
 0x1d9   :  { %v1866_v16 = vadd.f32 %v1240_v12, %v1828_v35 }
 0x1da   :  { %v1242_v17 = vpop.f32.mrf.mxu1 }
 0x1db   :  { %v614_v18 = vpack.c.bf16 %v1866_v16, %v1863_v14  ;;  %v1243_v20 = vadd.f32 %v1242_v17, %v1241_v13 }
 0x1dc   :  { %v1244_v19 = vpop.f32.mrf.mxu1 }
 0x1dd   :  { %1315 = vmatprep.mubr.bf16.mxu0 %v614_v18  ;;  %v1871_v25 = vadd.f32 %v1243_v20, %v1828_v35 }
 0x1de   :  { %v1245_v22 = vpop.f32.mrf.mxu1 }
 0x1df   :  { %v1246_v23 = vadd.f32 %v1245_v22, %v1244_v19 }
 0x1e0   :  { %v1247_v24 = vpop.f32.mrf.mxu1 }
 0x1e1   :  { %v1874_v15 = vadd.f32 %v1246_v23, %v1828_v35 }
 0x1e2   :  { %v1248_v37 = vpop.f32.mrf.mxu1 }
 0x1e3   :  { %v615_v36 = vpack.c.bf16 %v1874_v15, %v1871_v25  ;;  %v1249_v21 = vadd.f32 %v1248_v37, %v1247_v24 }
 0x1e4   :  { %v1250_v1 = vpop.f32.mrf.mxu1 }
 0x1e5   :  { %1316 = vmatmul.mubr.bf16.gmra.mxu0 %v615_v36  ;;  %v1879_v29 = vadd.f32 %v1249_v21, %v1828_v35 }
 0x1e6   :  { %v1251_v26 = vpop.f32.mrf.mxu1 }
 0x1e7   :  { %v1252_v27 = vadd.f32 %v1251_v26, %v1250_v1 }
 0x1e8   :  { %v1253_v28 = vpop.f32.mrf.mxu1 }
 0x1e9   :  { %v1882_v30 = vadd.f32 %v1252_v27, %v1828_v35 }
 0x1ea   :  { %v1254_v31 = vpop.f32.mrf.mxu1 }
 0x1eb   :  { %v616_v32 = vpack.c.bf16 %v1882_v30, %v1879_v29  ;;  %v1255_v34 = vadd.f32 %v1254_v31, %v1253_v28 }
 0x1ec   :  { %v1256_v33 = vpop.f32.mrf.mxu1 }
 0x1ed   :  { %1319 = vmatprep.mubr.bf16.mxu0 %v616_v32  ;;  %v1887_v40 = vadd.f32 %v1255_v34, %v1828_v35 }
 0x1ee   :  { %v1257_v38 = vpop.f32.mrf.mxu1 }
 0x1ef   :  { %v1258_v39 = vadd.f32 %v1257_v38, %v1256_v33 }
 0x1f1   :  { %v1890_v43 = vadd.f32 %v1258_v39, %v1828_v35  ;;  %v1411_v35 = vld [vmem:[%s2046_s9] sm:$0xff]  }
 0x1f2   :  { %1337 = vmatprep.subr.bf16.mxu1 %v1411_v35 }
 0x1f3   :  { %v617_v44 = vpack.c.bf16 %v1890_v43, %v1887_v40  ;;  %1338 = vmatpush3.bf16.msra.mxu1 %v1411_v35 }
 0x1f5   :  { %1320 = vmatmul.mubr.bf16.gmra.mxu0 %v617_v44 }
 0x285   :  { %v1309_v47 = vpop.f32.mrf.mxu0 }
 0x286   :  { %v732_v55 = vadd.f32 %v1309_v47, %v1161_v49 }
 0x287   :  { %v723_v48 = vpop.f32.mrf.mxu0 }
 0x288   :  { %v724_v53 = vadd.f32 %v1161_v49, %v723_v48  ;;  %v788_v63 = vmax.f32 %v732_v55, 0.0 }
 0x289   :  { %v1310_v52 = vpop.f32.mrf.mxu0 }
 0x28a   :  { %v735_v54 = vadd.f32 %v1310_v52, %v1161_v49  ;;  %v786_v61 = vmax.f32 %v724_v53, 0.0 }
 0x28b   :  { %v726_v56 = vpop.f32.mrf.mxu0 }
 0x28c   :  { %v727_v57 = vadd.f32 %v1161_v49, %v726_v56  ;;  %v789_v58 = vmax.f32 %v735_v54, 0.0 }
 0x28e   :  { %v787_v62 = vmax.f32 %v727_v57, 0.0  ;;  %v803_v2 = vpack.c.bf16 %v789_v58, %v788_v63 }
 0x290   :  { %v802_v0 = vpack.c.bf16 %v787_v62, %v786_v61  ;;  %v1909_v61 = vld [vmem:[%s2049_s10] ss:$0 sm:$0xff] }
 0x292   :  { %1339 = vmatprep.mubr.bf16.mxu1 %v802_v0 }
 0x293   :  { %1340 = vmatmul.mubr.bf16.vlgmr.msra.gmra.mxu1 %v803_v2 }
 0x295   :  { %v1313_v3 = vpop.f32.mrf.mxu0 }
 0x296   :  { %v748_v10 = vadd.f32 %v1313_v3, %v1161_v49 }
 0x297   :  { %v739_v4 = vpop.f32.mrf.mxu0 }
 0x298   :  { %v740_v8 = vadd.f32 %v1161_v49, %v739_v4  ;;  %v792_v19 = vmax.f32 %v748_v10, 0.0 }
 0x299   :  { %v1314_v7 = vpop.f32.mrf.mxu0 }
 0x29a   :  { %v751_v9 = vadd.f32 %v1314_v7, %v1161_v49  ;;  %v790_v17 = vmax.f32 %v740_v8, 0.0 }
 0x29b   :  { %v742_v11 = vpop.f32.mrf.mxu0 }
 0x29c   :  { %v743_v12 = vadd.f32 %v1161_v49, %v742_v11  ;;  %v793_v13 = vmax.f32 %v751_v9, 0.0 }
 0x29e   :  { %v791_v18 = vmax.f32 %v743_v12, 0.0  ;;  %v805_v22 = vpack.c.bf16 %v793_v13, %v792_v19 }
 0x2a0   :  { %v804_v20 = vpack.c.bf16 %v791_v18, %v790_v17 }
 0x2a2   :  { %1343 = vmatprep.mubr.bf16.mxu1 %v804_v20 }
 0x2a3   :  { %1344 = vmatmul.mubr.bf16.gmra.mxu1 %v805_v22 }
 0x2a5   :  { %v1317_v23 = vpop.f32.mrf.mxu0 }
 0x2a6   :  { %v764_v21 = vadd.f32 %v1317_v23, %v1161_v49 }
 0x2a7   :  { %v755_v24 = vpop.f32.mrf.mxu0 }
 0x2a8   :  { %v756_v36 = vadd.f32 %v1161_v49, %v755_v24  ;;  %v796_v33 = vmax.f32 %v764_v21, 0.0 }
 0x2a9   :  { %v1318_v37 = vpop.f32.mrf.mxu0 }
 0x2aa   :  { %v767_v1 = vadd.f32 %v1318_v37, %v1161_v49  ;;  %v794_v31 = vmax.f32 %v756_v36, 0.0 }
 0x2ab   :  { %v758_v26 = vpop.f32.mrf.mxu0 }
 0x2ac   :  { %v759_v27 = vadd.f32 %v1161_v49, %v758_v26  ;;  %v797_v28 = vmax.f32 %v767_v1, 0.0 }
 0x2ae   :  { %v795_v32 = vmax.f32 %v759_v27, 0.0  ;;  %v807_v38 = vpack.c.bf16 %v797_v28, %v796_v33 }
 0x2b0   :  { %v806_v34 = vpack.c.bf16 %v795_v32, %v794_v31 }
 0x2b2   :  { %1347 = vmatprep.mubr.bf16.mxu1 %v806_v34 }
 0x2b3   :  { %1348 = vmatmul.mubr.bf16.gmra.mxu1 %v807_v38 }
 0x2b5   :  { %v1321_v39 = vpop.f32.mrf.mxu0 }
 0x2b6   :  { %v780_v47 = vadd.f32 %v1321_v39, %v1161_v49 }
 0x2b7   :  { %v771_v44 = vpop.f32.mrf.mxu0 }
 0x2b8   :  { %v772_v46 = vadd.f32 %v1161_v49, %v771_v44  ;;  %v800_v56 = vmax.f32 %v780_v47, 0.0 }
 0x2b9   :  { %v1322_v45 = vpop.f32.mrf.mxu0 }
 0x2ba   :  { %v783_v35 = vadd.f32 %v1322_v45, %v1161_v49  ;;  %v798_v54 = vmax.f32 %v772_v46, 0.0 }
 0x2bb   :  { %v774_v48 = vpop.f32.mrf.mxu0 }
 0x2bc   :  { %v775_v52 = vadd.f32 %v1161_v49, %v774_v48  ;;  %v801_v53 = vmax.f32 %v783_v35, 0.0 }
 0x2be   :  { %v799_v55 = vmax.f32 %v775_v52, 0.0  ;;  %v809_v58 = vpack.c.bf16 %v801_v53, %v800_v56  ;;  %v1476_v56 = vld [vmem:[%s2040_s0 + $0x10] sm:$0xff] }
 0x2c0   :  { %v808_v57 = vpack.c.bf16 %v799_v55, %v798_v54 }
 0x2c2   :  { %1351 = vmatprep.mubr.bf16.mxu1 %v808_v57 }
 0x2c3   :  { %1352 = vmatmul.mubr.bf16.gmra.mxu1 %v809_v58 }
 0x353   :  { %v1341_v62 = vpop.f32.mrf.mxu1 }
 0x354   :  { %v924_v63 = vadd.f32 %v1341_v62, %v1909_v61 }
 0x355   :  { %v915_v0 = vpop.f32.mrf.mxu1 }
 0x356   :  { %v1181_v2 = vmul.f32 -1.442695, %v924_v63  ;;  %v916_v49 = vadd.f32 %v1909_v61, %v915_v0 }
 0x357   :  { %v1342_v3 = vpop.f32.mrf.mxu1 }
 0x358   :  { %1412 = vpow2.f32 %v1181_v2  ;;  %v1179_v4 = vmul.f32 -1.442695, %v916_v49  ;;  %v927_v7 = vadd.f32 %v1342_v3, %v1909_v61  ;;  %v1477_v3 = vld [vmem:[%s2040_s0] sm:$0xff] }
 0x359   :  { %v918_v8 = vpop.f32.mrf.mxu1 }
 0x35a   :  { %1414 = vpow2.f32 %v1179_v4  ;;  %v1182_v9 = vmul.f32 -1.442695, %v927_v7  ;;  %v919_v10 = vadd.f32 %v1909_v61, %v918_v8 }
 0x35c   :  { %1416 = vpow2.f32 %v1182_v9  ;;  %v1180_v11 = vmul.f32 -1.442695, %v919_v10 }
 0x35e   :  { %1418 = vpow2.f32 %v1180_v11 }
 0x363   :  { %v1345_v12 = vpop.f32.mrf.mxu1 }
 0x364   :  { %v940_v13 = vadd.f32 %v1345_v12, %v1909_v61  ;;  %v1478_v12 = vld [vmem:[%s2040_s0 + $0x18] sm:$0xff] }
 0x365   :  { %v1413_v17 = vpop.eup %1412  ;;  %v931_v18 = vpop.f32.mrf.mxu1 }
 0x366   :  { %v1028_v19 = vadd.f32 1.0, %v1413_v17  ;;  %v1185_v20 = vmul.f32 -1.442695, %v940_v13  ;;  %v932_v22 = vadd.f32 %v1909_v61, %v931_v18 }
 0x367   :  { %v1415_v23 = vpop.eup %1414  ;;  %v1346_v24 = vpop.f32.mrf.mxu1 }
 0x368   :  { %1420 = vrcp.f32 %v1028_v19  ;;  %v1026_v37 = vadd.f32 1.0, %v1415_v23  ;;  %v1183_v36 = vmul.f32 -1.442695, %v932_v22  ;;  %v943_v1 = vadd.f32 %v1346_v24, %v1909_v61  ;;  %v1479_v19 = vld [vmem:[%s2040_s0 + $0x8] sm:$0xff] }
 0x369   :  { %v1417_v21 = vpop.eup %1416  ;;  %1422 = vpow2.f32 %v1185_v20  ;;  %v934_v26 = vpop.f32.mrf.mxu1 }
 0x36a   :  { %1424 = vrcp.f32 %v1026_v37  ;;  %v1029_v27 = vadd.f32 1.0, %v1417_v21  ;;  %v1186_v28 = vmul.f32 -1.442695, %v943_v1  ;;  %v935_v31 = vadd.f32 %v1909_v61, %v934_v26 }
 0x36b   :  { %v1419_v32 = vpop.eup %1418  ;;  %1426 = vpow2.f32 %v1183_v36 }
 0x36c   :  { %1428 = vrcp.f32 %v1029_v27  ;;  %v1027_v33 = vadd.f32 1.0, %v1419_v32  ;;  %v1184_v34 = vmul.f32 -1.442695, %v935_v31 }
 0x36d   :  { %1430 = vpow2.f32 %v1186_v28 }
 0x36e   :  { %1432 = vrcp.f32 %v1027_v33 }
 0x36f   :  { %1434 = vpow2.f32 %v1184_v34 }
 0x373   :  { %v1349_v38 = vpop.f32.mrf.mxu1 }
 0x374   :  { %v956_v39 = vadd.f32 %v1349_v38, %v1909_v61  ;;  %v1480_v38 = vld [vmem:[%s2040_s0 + $0x30] sm:$0xff] }
 0x375   :  { %v1421_v44 = vpop.eup %1420  ;;  %v947_v45 = vpop.f32.mrf.mxu1 }
 0x376   :  { %v1423_v46 = vpop.eup %1422  ;;  %v1076_v35 = vmul.f32 %v1421_v44, %v1839_v50  ;;  %v1189_v47 = vmul.f32 -1.442695, %v956_v39  ;;  %v948_v48 = vadd.f32 %v1909_v61, %v947_v45 }
 0x377   :  { %v1425_v52 = vpop.eup %1424  ;;  %v1032_v53 = vadd.f32 1.0, %v1423_v46  ;;  %v1350_v54 = vpop.f32.mrf.mxu1 }
 0x378   :  { %v1427_v55 = vpop.eup %1426  ;;  %v1092_v57 = vadd.f32 %v1476_v56, %v1076_v35  ;;  %v1074_v58 = vmul.f32 %v1425_v52, %v1831_v41  ;;  %1436 = vpow2.f32 %v1189_v47  ;;  %v1187_v62 = vmul.f32 -1.442695, %v948_v48  ;;  %v1481_v48 = vld [vmem:[%s2040_s0 + $0x20] sm:$0xff] }
 0x379   :  { %v1429_v63 = vpop.eup %1428  ;;  %1438 = vrcp.f32 %v1032_v53  ;;  %v1030_v0 = vadd.f32 1.0, %v1427_v55  ;;  %v959_v50 = vadd.f32 %v1350_v54, %v1909_v61  ;;  %v950_v2 = vpop.f32.mrf.mxu1 }
 0x37a   :  { %v1431_v49 = vpop.eup %1430  ;;  %1108 = vst [vmem:[%s2050_s11 + $0x10] sm:$0xff] %v1092_v57  ;;  %v1090_v4 = vadd.f32 %v1477_v3, %v1074_v58  ;;  %v1077_v41 = vmul.f32 %v1429_v63, %v1842_v51  ;;  %1440 = vpow2.f32 %v1187_v62  ;;  %v951_v7 = vadd.f32 %v1909_v61, %v950_v2 }
 0x37b   :  { %v1433_v8 = vpop.eup %1432  ;;  %1442 = vrcp.f32 %v1030_v0  ;;  %v1033_v9 = vadd.f32 1.0, %v1431_v49  ;;  %v1190_v10 = vmul.f32 -1.442695, %v959_v50 }
 0x37c   :  { %v1435_v11 = vpop.eup %1434  ;;  %1106 = vst [vmem:[%s2050_s11] sm:$0xff] %v1090_v4  ;;  %v1093_v13 = vadd.f32 %v1478_v12, %v1077_v41  ;;  %v1075_v17 = vmul.f32 %v1433_v8, %v1834_v42  ;;  %v1188_v51 = vmul.f32 -1.442695, %v951_v7  ;;  %v1484_v4 = vld [vmem:[%s2040_s0 + $0x50] sm:$0xff] }
 0x37d   :  { %1444 = vrcp.f32 %v1033_v9  ;;  %v1031_v18 = vadd.f32 1.0, %v1435_v11 }
 0x37e   :  { %1109 = vst [vmem:[%s2050_s11 + $0x18] sm:$0xff] %v1093_v13  ;;  %v1091_v20 = vadd.f32 %v1479_v19, %v1075_v17  ;;  %1446 = vpow2.f32 %v1190_v10 }
 0x37f   :  { %1448 = vrcp.f32 %v1031_v18  ;;  %v1486_v18 = vld [vmem:[%s2040_s0 + $0x58] sm:$0xff] }
 0x380   :  { %1107 = vst [vmem:[%s2050_s11 + $0x8] sm:$0xff] %v1091_v20  ;;  %1450 = vpow2.f32 %v1188_v51 }
 0x383   :  { %v1353_v42 = vpop.f32.mrf.mxu1 }
 0x384   :  { %v972_v22 = vadd.f32 %v1353_v42, %v1909_v61  ;;  %v1487_v42 = vld [vmem:[%s2040_s0 + $0x48] sm:$0xff] }
 0x385   :  { %v1437_v23 = vpop.eup %1436  ;;  %v963_v24 = vpop.f32.mrf.mxu1 }
 0x386   :  { %v1439_v37 = vpop.eup %1438  ;;  %v1036_v36 = vadd.f32 1.0, %v1437_v23  ;;  %v1193_v1 = vmul.f32 -1.442695, %v972_v22  ;;  %v964_v21 = vadd.f32 %v1909_v61, %v963_v24 }
 0x387   :  { %v1441_v26 = vpop.eup %1440  ;;  %v1080_v27 = vmul.f32 %v1439_v37, %v1855_v5  ;;  %v1354_v28 = vpop.f32.mrf.mxu1 }
 0x388   :  { %v1443_v31 = vpop.eup %1442  ;;  %1452 = vrcp.f32 %v1036_v36  ;;  %v1034_v32 = vadd.f32 1.0, %v1441_v26  ;;  %v1191_v33 = vmul.f32 -1.442695, %v964_v21  ;;  %v975_v34 = vadd.f32 %v1354_v28, %v1909_v61  ;;  %v1489_v26 = vld [vmem:[%s2040_s0 + $0x60] sm:$0xff]  ;;  %v1490_v28 = vld [vmem:[%s2040_s0 + $0x78] sm:$0xff] }
 0x389   :  { %v1096_v39 = vadd.f32 %v1480_v38, %v1080_v27  ;;  %v1078_v44 = vmul.f32 %v1443_v31, %v1847_v59  ;;  %1454 = vpow2.f32 %v1193_v1  ;;  %v966_v45 = vpop.f32.mrf.mxu1 }
 0x38a   :  { %v1445_v46 = vpop.eup %1444  ;;  %1456 = vrcp.f32 %v1034_v32  ;;  %v1194_v35 = vmul.f32 -1.442695, %v975_v34  ;;  %v967_v5 = vadd.f32 %v1909_v61, %v966_v45  ;;  %v1482_v61 = vld [vmem:[%s2040_s0 + $0x38] sm:$0xff] }
 0x38b   :  { %v1447_v47 = vpop.eup %1446  ;;  %1112 = vst [vmem:[%s2050_s11 + $0x30] sm:$0xff] %v1096_v39  ;;  %v1094_v52 = vadd.f32 %v1481_v48, %v1078_v44  ;;  %v1081_v53 = vmul.f32 %v1445_v46, %v1858_v6  ;;  %1458 = vpow2.f32 %v1191_v33  ;;  %v1483_v6 = vld [vmem:[%s2040_s0 + $0x28] sm:$0xff] }
 0x38c   :  { %v1449_v59 = vpop.eup %1448  ;;  %v1037_v54 = vadd.f32 1.0, %v1447_v47  ;;  %1460 = vpow2.f32 %v1194_v35  ;;  %v1192_v55 = vmul.f32 -1.442695, %v967_v5 }
 0x38d   :  { %v1451_v56 = vpop.eup %1450  ;;  %1110 = vst [vmem:[%s2050_s11 + $0x20] sm:$0xff] %v1094_v52  ;;  %v1097_v57 = vadd.f32 %v1482_v61, %v1081_v53  ;;  %v1079_v58 = vmul.f32 %v1449_v59, %v1850_v60 }
 0x38e   :  { %1462 = vrcp.f32 %v1037_v54  ;;  %v1035_v62 = vadd.f32 1.0, %v1451_v56 }
 0x38f   :  { %1113 = vst [vmem:[%s2050_s11 + $0x38] sm:$0xff] %v1097_v57  ;;  %v1095_v63 = vadd.f32 %v1483_v6, %v1079_v58  ;;  %1464 = vpow2.f32 %v1192_v55 }
 0x390   :  { %1466 = vrcp.f32 %v1035_v62 }
 0x391   :  { %1111 = vst [vmem:[%s2050_s11 + $0x28] sm:$0xff] %v1095_v63 }
 0x395   :  { %v1453_v0 = vpop.eup %1452 }
 0x396   :  { %v1455_v50 = vpop.eup %1454  ;;  %v1084_v60 = vmul.f32 %v1453_v0, %v1871_v25  ;;  %v1485_v25 = vld [vmem:[%s2040_s0 + $0x40] sm:$0xff] }
 0x397   :  { %v1457_v2 = vpop.eup %1456  ;;  %v1040_v49 = vadd.f32 1.0, %v1455_v50 }
 0x398   :  { %v1459_v3 = vpop.eup %1458  ;;  %v1100_v41 = vadd.f32 %v1484_v4, %v1084_v60  ;;  %v1082_v7 = vmul.f32 %v1457_v2, %v1863_v14 }
 0x399   :  { %v1461_v8 = vpop.eup %1460  ;;  %1468 = vrcp.f32 %v1040_v49  ;;  %v1038_v9 = vadd.f32 1.0, %v1459_v3 }
 0x39a   :  { %1116 = vst [vmem:[%s2050_s11 + $0x50] sm:$0xff] %v1100_v41  ;;  %v1098_v10 = vadd.f32 %v1485_v25, %v1082_v7  ;;  %v1041_v11 = vadd.f32 1.0, %v1461_v8 }
 0x39b   :  { %v1463_v12 = vpop.eup %1462  ;;  %1470 = vrcp.f32 %v1038_v9 }
 0x39c   :  { %v1465_v13 = vpop.eup %1464  ;;  %1114 = vst [vmem:[%s2050_s11 + $0x40] sm:$0xff] %v1098_v10  ;;  %v1085_v14 = vmul.f32 %v1463_v12, %v1874_v15  ;;  %1472 = vrcp.f32 %v1041_v11 }
 0x39d   :  { %v1467_v17 = vpop.eup %1466  ;;  %v1039_v51 = vadd.f32 1.0, %v1465_v13 }
 0x39e   :  { %v1101_v19 = vadd.f32 %v1486_v18, %v1085_v14  ;;  %v1083_v20 = vmul.f32 %v1467_v17, %v1866_v16  ;;  %v1488_v16 = vld [vmem:[%s2040_s0 + $0x70] sm:$0xff] }
 0x39f   :  { %1474 = vrcp.f32 %v1039_v51 }
 0x3a0   :  { %1117 = vst [vmem:[%s2050_s11 + $0x58] sm:$0xff] %v1101_v19  ;;  %v1099_v15 = vadd.f32 %v1487_v42, %v1083_v20 }
 0x3a2   :  { %1115 = vst [vmem:[%s2050_s11 + $0x48] sm:$0xff] %v1099_v15 }
 0x3a6   :  { %v1469_v22 = vpop.eup %1468 }
 0x3a7   :  { %v1088_v23 = vmul.f32 %v1469_v22, %v1887_v40 }
 0x3a8   :  { %v1471_v24 = vpop.eup %1470 }
 0x3a9   :  { %v1473_v37 = vpop.eup %1472  ;;  %v1104_v36 = vadd.f32 %v1488_v16, %v1088_v23  ;;  %v1086_v1 = vmul.f32 %v1471_v24, %v1879_v29 }
 0x3aa   :  { %v1089_v21 = vmul.f32 %v1473_v37, %v1890_v43  ;;  %v1491_v43 = vld [vmem:[%s2040_s0 + $0x68] sm:$0xff] }
 0x3ab   :  { %1120 = vst [vmem:[%s2050_s11 + $0x70] sm:$0xff] %v1104_v36  ;;  %v1102_v40 = vadd.f32 %v1489_v26, %v1086_v1 }
 0x3ac   :  { %v1475_v27 = vpop.eup %1474  ;;  %v1105_v31 = vadd.f32 %v1490_v28, %v1089_v21 }
 0x3ad   :  { %1118 = vst [vmem:[%s2050_s11 + $0x60] sm:$0xff] %v1102_v40  ;;  %v1087_v29 = vmul.f32 %v1475_v27, %v1882_v30 }
 0x3ae   :  { %1121 = vst [vmem:[%s2050_s11 + $0x78] sm:$0xff] %v1105_v31 }
 0x3af   :  { %v1103_v32 = vadd.f32 %v1491_v43, %v1087_v29 }
 0x3b1   :  { %1119 = vst [vmem:[%s2050_s11 + $0x68] sm:$0xff] %v1103_v32 }

</bundles_post_ra>
